<compile_context>
chip_gen: v7x
topology: tpu7x:2x2x1
jax: 0.10.0
libtpu: 0.0.40
codegen_flags: <defaults>
</compile_context>

<pallas_src>
import math
import functools

import jax
import jax.numpy as jnp
from jax.experimental import pallas as pl
from jax.experimental.pallas import tpu as pltpu


# ----------------------------- Pallas kernel ------------------------------ #

def _denoise_kernel(ts_ref, xy_ref,
                    freq_ref, phase_ref,
                    wt1_ref, bt1_ref,
                    wt2_ref, wxy_ref, b2_ref,
                    w0_ref, b0_ref, w1_ref, b1_ref,
                    wh_ref, bh_ref,
                    out_ref):
    f32 = jnp.float32
    bf16 = jnp.bfloat16

    # Sinusoidal timestep embedding computed on-chip instead of streaming [TB,128] from HBM:
    #   temb = cos(t * freq - phase), phase = 0 for the cos half, pi/2 for the sin half.
    t = ts_ref[...]                                        # (TB, 1) f32
    temb = jnp.cos(t * freq_ref[...] - phase_ref[...])     # (TB, dim_t) f32

    # time_embed[0]: Linear -> SiLU   (elementwise kept in f32)
    h = jnp.dot(temb.astype(bf16), wt1_ref[...], preferred_element_type=f32) + bt1_ref[...]
    h = h * jax.nn.sigmoid(h)

    # Fused: time_embed[2](h) + proj(x) + SiLU(label_emb(y)) + (b_t2 + b_proj)
    #   xy = [x | one_hot(y)] streamed; wxy stacks [proj_w.T ; silu(label_emb)].
    h = (jnp.dot(h.astype(bf16), wt2_ref[...], preferred_element_type=f32)
         + jnp.dot(xy_ref[...].astype(bf16), wxy_ref[...], preferred_element_type=f32)
         + b2_ref[...])

    # MLP.make_baseline: 2x (Linear -> ReLU -> Dropout(p=0) == identity), then head Linear.
    h = jnp.maximum(
        jnp.dot(h.astype(bf16), w0_ref[...], preferred_element_type=f32) + b0_ref[...], 0.0)
    h = jnp.maximum(
        jnp.dot(h.astype(bf16), w1_ref[...], preferred_element_type=f32) + b1_ref[...], 0.0)
    out = jnp.dot(h.astype(bf16), wh_ref[...], preferred_element_type=f32) + bh_ref[...]
    out_ref[...] = out.astype(out_ref.dtype)


# ------------------------------ JAX wrapper -------------------------------- #

def _round_up(n, m):
    return ((n + m - 1) // m) * m


def timestep_embedding(timesteps, dim, max_period=10000.0):
    """Sinusoidal embedding, matching the PyTorch reference (used by the f32 reference)."""
    half = dim // 2
    freqs = jnp.exp(
        -math.log(max_period) * jnp.arange(half, dtype=jnp.float32) / half)
    args = timesteps.astype(jnp.float32)[:, None] * freqs[None, :]
    emb = jnp.concatenate([jnp.cos(args), jnp.sin(args)], axis=-1)
    if dim % 2:
        emb = jnp.concatenate([emb, jnp.zeros_like(emb[:, :1])], axis=-1)
    return emb


def init_params(key, d_in, dim_t, d_layers, n_unq_y):
    """Deterministic synthetic parameters (PyTorch-Linear shapes [out, in])."""
    keys = jax.random.split(key, 16)
    it = iter(keys)

    def lin(k, d_out, d_inn, scale=0.05):
        kw, kb = jax.random.split(k)
        w = scale * jax.random.normal(kw, (d_out, d_inn), jnp.float32)
        b = scale * jax.random.normal(kb, (d_out,), jnp.float32)
        return w, b

    p = {}
    p["proj_w"], p["proj_b"] = lin(next(it), dim_t, d_in)
    p["t1_w"], p["t1_b"] = lin(next(it), dim_t, dim_t)
    p["t2_w"], p["t2_b"] = lin(next(it), dim_t, dim_t)
    p["label_emb"] = 0.05 * jax.random.normal(next(it), (n_unq_y, dim_t), jnp.float32)
    p["mlp0_w"], p["mlp0_b"] = lin(next(it), d_layers[0], dim_t)
    p["mlp1_w"], p["mlp1_b"] = lin(next(it), d_layers[1], d_layers[0])
    p["head_w"], p["head_b"] = lin(next(it), d_in, d_layers[1])
    return p


@functools.partial(jax.jit, static_argnames=("dim_t", "block_b"))
def mlp_denoise_fn(params, x, timesteps, y, dim_t=128, block_b=512):
    # TODO(synk): only the n_unq_y > 0, is_y_cond=True branch (nn.Embedding label_emb) is
    # implemented; the continuous-label (nn.Linear(1, dim_t)) branch is not.
    B, d_in = x.shape
    n_unq_y = params["label_emb"].shape[0]

    # Batch tiling: multiple of 8 (f32 sublane tile), padded to a tile multiple.
    tb = min(block_b, _round_up(B, 8))
    Bp = _round_up(B, tb)
    nb = Bp // tb

    # Streamed per-row inputs: timestep column + [x | one_hot(y)].
    onehot = jax.nn.one_hot(y, n_unq_y, dtype=jnp.float32)             # [B, n_unq_y]
    xy = jnp.concatenate([x.astype(jnp.float32), onehot], axis=-1)     # [B, d_in + n_unq_y]
    ts = timesteps.astype(jnp.float32).reshape(B, 1)                   # [B, 1]
    if Bp != B:
        pad = Bp - B
        xy = jnp.pad(xy, ((0, pad), (0, 0)))
        ts = jnp.pad(ts, ((0, pad), (0, 0)))

    # Constants for in-kernel sinusoidal embedding: temb = cos(t*freq - phase).
    half = dim_t // 2
    freqs = jnp.exp(-math.log(10000.0) * jnp.arange(half, dtype=jnp.float32) / half)
    freq_row = jnp.concatenate([freqs, freqs]).reshape(1, dim_t)
    phase_row = jnp.concatenate(
        [jnp.zeros((half,), jnp.float32),
         jnp.full((half,), math.pi / 2.0, jnp.float32)]).reshape(1, dim_t)

    bf16 = jnp.bfloat16

    def t(w):   # [out, in] -> [in, out] bf16 so the kernel computes x @ W on the MXU
        return jnp.transpose(w).astype(bf16)

    def b2(b):  # bias -> [1, out] f32 for in-kernel broadcasting
        return b.reshape(1, -1).astype(jnp.float32)

    # Fused proj + label weight and fused bias.
    wxy = jnp.concatenate(
        [jnp.transpose(params["proj_w"]), jax.nn.silu(params["label_emb"])],
        axis=0).astype(bf16)                                           # [d_in + n_unq_y, dim_t]
    bias2 = (params["t2_b"] + params["proj_b"]).reshape(1, -1).astype(jnp.float32)

    weight_inputs = (
        freq_row, phase_row,
        t(params["t1_w"]), b2(params["t1_b"]),
        t(params["t2_w"]), wxy, bias2,
        t(params["mlp0_w"]), b2(params["mlp0_b"]),
        t(params["mlp1_w"]), b2(params["mlp1_b"]),
        t(params["head_w"]), b2(params["head_b"]),
    )

    in_specs = (
        [pl.BlockSpec((tb, 1), lambda i: (i, 0)),                 # timesteps: streamed
         pl.BlockSpec((tb, d_in + n_unq_y), lambda i: (i, 0))]    # [x | one_hot]: streamed
        + [pl.BlockSpec(w.shape, lambda i: (0, 0)) for w in weight_inputs]  # VMEM-resident
    )

    out = pl.pallas_call(
        _denoise_kernel,
        out_shape=jax.ShapeDtypeStruct((Bp, d_in), jnp.float32),
        grid=(nb,),
        in_specs=in_specs,
        out_specs=pl.BlockSpec((tb, d_in), lambda i: (i, 0)),
        compiler_params=pltpu.CompilerParams(
            dimension_semantics=("parallel",),
            vmem_limit_bytes=32 * 1024 * 1024,
        ),
    )(ts, xy, *weight_inputs)
    return out[:B]


# ------------------------- pure-JAX reference check ------------------------ #

def reference_forward(params, x, timesteps, y, dim_t=128):
    temb = timestep_embedding(timesteps, dim_t)
    h = temb @ params["t1_w"].T + params["t1_b"]
    h = jax.nn.silu(h)
    emb = h @ params["t2_w"].T + params["t2_b"]
    emb = emb + jax.nn.silu(params["label_emb"][y])
    h = x.astype(jnp.float32) @ params["proj_w"].T + params["proj_b"] + emb
    h = jnp.maximum(h @ params["mlp0_w"].T + params["mlp0_b"], 0.0)
    h = jnp.maximum(h @ params["mlp1_w"].T + params["mlp1_b"], 0.0)
    return h @ params["head_w"].T + params["head_b"]


if __name__ == "__main__":
    B = 200            # not a tile multiple on purpose (exercises padding + grid of 4)
    d_in = 16
    dim_t = 128
    d_layers = [128, 128]
    n_unq_y = 4

    key = jax.random.PRNGKey(0)
    kp, kx, kt, ky = jax.random.split(key, 4)

    params = init_params(kp, d_in, dim_t, d_layers, n_unq_y)
    x = jax.random.normal(kx, (B, d_in), jnp.float32)
    timesteps = jax.random.randint(kt, (B,), 0, 1000).astype(jnp.int32)
    y = jax.random.randint(ky, (B,), 0, n_unq_y).astype(jnp.int32)

    out = mlp_denoise_fn(params, x, timesteps, y, dim_t=dim_t, block_b=64)
    out = jax.block_until_ready(out)

    ref = reference_forward(params, x, timesteps, y, dim_t=dim_t)
    assert out.shape == (B, d_in)
    max_err = float(jnp.max(jnp.abs(out - ref)))
    # bf16 MXU inputs with f32 accumulation -> allow a small tolerance vs the f32 reference.
    assert jnp.allclose(out, ref, atol=2e-2, rtol=2e-2), f"mismatch vs reference (max abs err {max_err})"

    print("KERNEL_OK")
</pallas_src>

<mosaic_0001>
module attributes {stable_mosaic.version = 11 : i64} {
  func.func @_denoise_kernel(%arg0: i32, %arg1: memref<64x1xf32, #tpu.memory_space<vmem>>, %arg2: memref<64x20xf32, #tpu.memory_space<vmem>>, %arg3: memref<1x128xf32, #tpu.memory_space<vmem>>, %arg4: memref<1x128xf32, #tpu.memory_space<vmem>>, %arg5: memref<128x128xbf16, #tpu.memory_space<vmem>>, %arg6: memref<1x128xf32, #tpu.memory_space<vmem>>, %arg7: memref<128x128xbf16, #tpu.memory_space<vmem>>, %arg8: memref<20x128xbf16, #tpu.memory_space<vmem>>, %arg9: memref<1x128xf32, #tpu.memory_space<vmem>>, %arg10: memref<128x128xbf16, #tpu.memory_space<vmem>>, %arg11: memref<1x128xf32, #tpu.memory_space<vmem>>, %arg12: memref<128x128xbf16, #tpu.memory_space<vmem>>, %arg13: memref<1x128xf32, #tpu.memory_space<vmem>>, %arg14: memref<128x16xbf16, #tpu.memory_space<vmem>>, %arg15: memref<1x16xf32, #tpu.memory_space<vmem>>, %arg16: memref<64x16xf32, #tpu.memory_space<vmem>>) attributes {dimension_semantics = [#tpu.dimension_semantics<parallel>], iteration_bounds = array<i64: 4>, scalar_prefetch = 0 : i64, scratch_operands = 0 : i64, tpu.core_type = #tpu.core_type<tc>, window_params = [{transform_indices = @transform_0, window_bounds = array<i64: 64, 1>}, {transform_indices = @transform_1, window_bounds = array<i64: 64, 20>}, {pipeline_mode = #tpu.pipeline_mode<synchronous>, transform_indices = @transform_2, window_bounds = array<i64: 1, 128>}, {pipeline_mode = #tpu.pipeline_mode<synchronous>, transform_indices = @transform_3, window_bounds = array<i64: 1, 128>}, {pipeline_mode = #tpu.pipeline_mode<synchronous>, transform_indices = @transform_4, window_bounds = array<i64: 128, 128>}, {pipeline_mode = #tpu.pipeline_mode<synchronous>, transform_indices = @transform_5, window_bounds = array<i64: 1, 128>}, {pipeline_mode = #tpu.pipeline_mode<synchronous>, transform_indices = @transform_6, window_bounds = array<i64: 128, 128>}, {pipeline_mode = #tpu.pipeline_mode<synchronous>, transform_indices = @transform_7, window_bounds = array<i64: 20, 128>}, {pipeline_mode = #tpu.pipeline_mode<synchronous>, transform_indices = @transform_8, window_bounds = array<i64: 1, 128>}, {pipeline_mode = #tpu.pipeline_mode<synchronous>, transform_indices = @transform_9, window_bounds = array<i64: 128, 128>}, {pipeline_mode = #tpu.pipeline_mode<synchronous>, transform_indices = @transform_10, window_bounds = array<i64: 1, 128>}, {pipeline_mode = #tpu.pipeline_mode<synchronous>, transform_indices = @transform_11, window_bounds = array<i64: 128, 128>}, {pipeline_mode = #tpu.pipeline_mode<synchronous>, transform_indices = @transform_12, window_bounds = array<i64: 1, 128>}, {pipeline_mode = #tpu.pipeline_mode<synchronous>, transform_indices = @transform_13, window_bounds = array<i64: 128, 16>}, {pipeline_mode = #tpu.pipeline_mode<synchronous>, transform_indices = @transform_14, window_bounds = array<i64: 1, 16>}, {transform_indices = @transform_15, window_bounds = array<i64: 64, 16>}]} {
    %c0 = arith.constant 0 : index
    %c0_0 = arith.constant 0 : index
    %0 = vector.load %arg1[%c0, %c0_0] : memref<64x1xf32, #tpu.memory_space<vmem>>, vector<64x1xf32>
    %c0_1 = arith.constant 0 : index
    %c0_2 = arith.constant 0 : index
    %1 = vector.load %arg3[%c0_1, %c0_2] : memref<1x128xf32, #tpu.memory_space<vmem>>, vector<1x128xf32>
    %2 = vector.broadcast %0 : vector<64x1xf32> to vector<64x128xf32>
    %3 = vector.broadcast %1 : vector<1x128xf32> to vector<64x128xf32>
    %4 = arith.mulf %2, %3 : vector<64x128xf32>
    %c0_3 = arith.constant 0 : index
    %c0_4 = arith.constant 0 : index
    %5 = vector.load %arg4[%c0_3, %c0_4] : memref<1x128xf32, #tpu.memory_space<vmem>>, vector<1x128xf32>
    %6 = vector.broadcast %5 : vector<1x128xf32> to vector<64x128xf32>
    %7 = arith.subf %4, %6 : vector<64x128xf32>
    %8 = math.cos %7 : vector<64x128xf32>
    %9 = arith.truncf %8 : vector<64x128xf32> to vector<64x128xbf16>
    %c0_5 = arith.constant 0 : index
    %c0_6 = arith.constant 0 : index
    %10 = vector.load %arg5[%c0_5, %c0_6] : memref<128x128xbf16, #tpu.memory_space<vmem>>, vector<128x128xbf16>
    %cst = arith.constant dense<0.000000e+00> : vector<64x128xf32>
    %11 = tpu.matmul %9, %10, %cst {dimension_numbers = #tpu.dot_dimension_numbers<[1], [0], [0], [1], [0, 0, 1, 1], [], []>} : vector<64x128xbf16>, vector<128x128xbf16>, vector<64x128xf32> -> vector<64x128xf32>
    %c0_7 = arith.constant 0 : index
    %c0_8 = arith.constant 0 : index
    %12 = vector.load %arg6[%c0_7, %c0_8] : memref<1x128xf32, #tpu.memory_space<vmem>>, vector<1x128xf32>
    %13 = vector.broadcast %12 : vector<1x128xf32> to vector<64x128xf32>
    %14 = arith.addf %11, %13 : vector<64x128xf32>
    %15 = arith.negf %14 : vector<64x128xf32>
    %16 = math.exp %15 : vector<64x128xf32>
    %cst_9 = arith.constant 1.000000e+00 : f32
    %17 = vector.broadcast %cst_9 : f32 to vector<64x128xf32>
    %18 = arith.addf %17, %16 : vector<64x128xf32>
    %19 = arith.divf %17, %18 : vector<64x128xf32>
    %20 = arith.mulf %14, %19 : vector<64x128xf32>
    %21 = arith.truncf %20 : vector<64x128xf32> to vector<64x128xbf16>
    %c0_10 = arith.constant 0 : index
    %c0_11 = arith.constant 0 : index
    %22 = vector.load %arg7[%c0_10, %c0_11] : memref<128x128xbf16, #tpu.memory_space<vmem>>, vector<128x128xbf16>
    %cst_12 = arith.constant dense<0.000000e+00> : vector<64x128xf32>
    %23 = tpu.matmul %21, %22, %cst_12 {dimension_numbers = #tpu.dot_dimension_numbers<[1], [0], [0], [1], [0, 0, 1, 1], [], []>} : vector<64x128xbf16>, vector<128x128xbf16>, vector<64x128xf32> -> vector<64x128xf32>
    %c0_13 = arith.constant 0 : index
    %c0_14 = arith.constant 0 : index
    %24 = vector.load %arg2[%c0_13, %c0_14] : memref<64x20xf32, #tpu.memory_space<vmem>>, vector<64x20xf32>
    %25 = arith.truncf %24 : vector<64x20xf32> to vector<64x20xbf16>
    %c0_15 = arith.constant 0 : index
    %c0_16 = arith.constant 0 : index
    %26 = vector.load %arg8[%c0_15, %c0_16] : memref<20x128xbf16, #tpu.memory_space<vmem>>, vector<20x128xbf16>
    %cst_17 = arith.constant dense<0.000000e+00> : vector<64x128xf32>
    %27 = tpu.matmul %25, %26, %cst_17 {dimension_numbers = #tpu.dot_dimension_numbers<[1], [0], [0], [1], [0, 0, 1, 1], [], []>} : vector<64x20xbf16>, vector<20x128xbf16>, vector<64x128xf32> -> vector<64x128xf32>
    %28 = arith.addf %23, %27 : vector<64x128xf32>
    %c0_18 = arith.constant 0 : index
    %c0_19 = arith.constant 0 : index
    %29 = vector.load %arg9[%c0_18, %c0_19] : memref<1x128xf32, #tpu.memory_space<vmem>>, vector<1x128xf32>
    %30 = vector.broadcast %29 : vector<1x128xf32> to vector<64x128xf32>
    %31 = arith.addf %28, %30 : vector<64x128xf32>
    %32 = arith.truncf %31 : vector<64x128xf32> to vector<64x128xbf16>
    %c0_20 = arith.constant 0 : index
    %c0_21 = arith.constant 0 : index
    %33 = vector.load %arg10[%c0_20, %c0_21] : memref<128x128xbf16, #tpu.memory_space<vmem>>, vector<128x128xbf16>
    %cst_22 = arith.constant dense<0.000000e+00> : vector<64x128xf32>
    %34 = tpu.matmul %32, %33, %cst_22 {dimension_numbers = #tpu.dot_dimension_numbers<[1], [0], [0], [1], [0, 0, 1, 1], [], []>} : vector<64x128xbf16>, vector<128x128xbf16>, vector<64x128xf32> -> vector<64x128xf32>
    %c0_23 = arith.constant 0 : index
    %c0_24 = arith.constant 0 : index
    %35 = vector.load %arg11[%c0_23, %c0_24] : memref<1x128xf32, #tpu.memory_space<vmem>>, vector<1x128xf32>
    %36 = vector.broadcast %35 : vector<1x128xf32> to vector<64x128xf32>
    %37 = arith.addf %34, %36 : vector<64x128xf32>
    %cst_25 = arith.constant 0.000000e+00 : f32
    %38 = vector.broadcast %cst_25 : f32 to vector<64x128xf32>
    %39 = arith.maximumf %37, %38 : vector<64x128xf32>
    %40 = arith.truncf %39 : vector<64x128xf32> to vector<64x128xbf16>
    %c0_26 = arith.constant 0 : index
    %c0_27 = arith.constant 0 : index
    %41 = vector.load %arg12[%c0_26, %c0_27] : memref<128x128xbf16, #tpu.memory_space<vmem>>, vector<128x128xbf16>
    %cst_28 = arith.constant dense<0.000000e+00> : vector<64x128xf32>
    %42 = tpu.matmul %40, %41, %cst_28 {dimension_numbers = #tpu.dot_dimension_numbers<[1], [0], [0], [1], [0, 0, 1, 1], [], []>} : vector<64x128xbf16>, vector<128x128xbf16>, vector<64x128xf32> -> vector<64x128xf32>
    %c0_29 = arith.constant 0 : index
    %c0_30 = arith.constant 0 : index
    %43 = vector.load %arg13[%c0_29, %c0_30] : memref<1x128xf32, #tpu.memory_space<vmem>>, vector<1x128xf32>
    %44 = vector.broadcast %43 : vector<1x128xf32> to vector<64x128xf32>
    %45 = arith.addf %42, %44 : vector<64x128xf32>
    %cst_31 = arith.constant 0.000000e+00 : f32
    %46 = vector.broadcast %cst_31 : f32 to vector<64x128xf32>
    %47 = arith.maximumf %45, %46 : vector<64x128xf32>
    %48 = arith.truncf %47 : vector<64x128xf32> to vector<64x128xbf16>
    %c0_32 = arith.constant 0 : index
    %c0_33 = arith.constant 0 : index
    %49 = vector.load %arg14[%c0_32, %c0_33] : memref<128x16xbf16, #tpu.memory_space<vmem>>, vector<128x16xbf16>
    %cst_34 = arith.constant dense<0.000000e+00> : vector<64x16xf32>
    %50 = tpu.matmul %48, %49, %cst_34 {dimension_numbers = #tpu.dot_dimension_numbers<[1], [0], [0], [1], [0, 0, 1, 1], [], []>} : vector<64x128xbf16>, vector<128x16xbf16>, vector<64x16xf32> -> vector<64x16xf32>
    %c0_35 = arith.constant 0 : index
    %c0_36 = arith.constant 0 : index
    %51 = vector.load %arg15[%c0_35, %c0_36] : memref<1x16xf32, #tpu.memory_space<vmem>>, vector<1x16xf32>
    %52 = vector.broadcast %51 : vector<1x16xf32> to vector<64x16xf32>
    %53 = arith.addf %50, %52 : vector<64x16xf32>
    %c0_37 = arith.constant 0 : index
    %c0_38 = arith.constant 0 : index
    %54 = vector.load %arg16[%c0_37, %c0_38] : memref<64x16xf32, #tpu.memory_space<vmem>>, vector<64x16xf32>
    tpu.vector_store %arg16[%c0_37, %c0_38], %53 {strides = array<i32>} : memref<64x16xf32, #tpu.memory_space<vmem>>, vector<64x16xf32>,
    return
  }
  func.func @transform_0(%arg0: i32) -> (i32, i32) {
    %c0_i32 = arith.constant 0 : i32
    %c0_i32_0 = arith.constant 0 : i32
    return %arg0, %c0_i32 : i32, i32
  }
  func.func @transform_1(%arg0: i32) -> (i32, i32) {
    %c0_i32 = arith.constant 0 : i32
    %c0_i32_0 = arith.constant 0 : i32
    return %arg0, %c0_i32 : i32, i32
  }
  func.func @transform_2(%arg0: i32) -> (i32, i32) {
    %c0_i32 = arith.constant 0 : i32
    %c0_i32_0 = arith.constant 0 : i32
    %c0_i32_1 = arith.constant 0 : i32
    return %c0_i32, %c0_i32_0 : i32, i32
  }
  func.func @transform_3(%arg0: i32) -> (i32, i32) {
    %c0_i32 = arith.constant 0 : i32
    %c0_i32_0 = arith.constant 0 : i32
    %c0_i32_1 = arith.constant 0 : i32
    return %c0_i32, %c0_i32_0 : i32, i32
  }
  func.func @transform_4(%arg0: i32) -> (i32, i32) {
    %c0_i32 = arith.constant 0 : i32
    %c0_i32_0 = arith.constant 0 : i32
    %c0_i32_1 = arith.constant 0 : i32
    return %c0_i32, %c0_i32_0 : i32, i32
  }
  func.func @transform_5(%arg0: i32) -> (i32, i32) {
    %c0_i32 = arith.constant 0 : i32
    %c0_i32_0 = arith.constant 0 : i32
    %c0_i32_1 = arith.constant 0 : i32
    return %c0_i32, %c0_i32_0 : i32, i32
  }
  func.func @transform_6(%arg0: i32) -> (i32, i32) {
    %c0_i32 = arith.constant 0 : i32
    %c0_i32_0 = arith.constant 0 : i32
    %c0_i32_1 = arith.constant 0 : i32
    return %c0_i32, %c0_i32_0 : i32, i32
  }
  func.func @transform_7(%arg0: i32) -> (i32, i32) {
    %c0_i32 = arith.constant 0 : i32
    %c0_i32_0 = arith.constant 0 : i32
    %c0_i32_1 = arith.constant 0 : i32
    return %c0_i32, %c0_i32_0 : i32, i32
  }
  func.func @transform_8(%arg0: i32) -> (i32, i32) {
    %c0_i32 = arith.constant 0 : i32
    %c0_i32_0 = arith.constant 0 : i32
    %c0_i32_1 = arith.constant 0 : i32
    return %c0_i32, %c0_i32_0 : i32, i32
  }
  func.func @transform_9(%arg0: i32) -> (i32, i32) {
    %c0_i32 = arith.constant 0 : i32
    %c0_i32_0 = arith.constant 0 : i32
    %c0_i32_1 = arith.constant 0 : i32
    return %c0_i32, %c0_i32_0 : i32, i32
  }
  func.func @transform_10(%arg0: i32) -> (i32, i32) {
    %c0_i32 = arith.constant 0 : i32
    %c0_i32_0 = arith.constant 0 : i32
    %c0_i32_1 = arith.constant 0 : i32
    return %c0_i32, %c0_i32_0 : i32, i32
  }
  func.func @transform_11(%arg0: i32) -> (i32, i32) {
    %c0_i32 = arith.constant 0 : i32
    %c0_i32_0 = arith.constant 0 : i32
    %c0_i32_1 = arith.constant 0 : i32
    return %c0_i32, %c0_i32_0 : i32, i32
  }
  func.func @transform_12(%arg0: i32) -> (i32, i32) {
    %c0_i32 = arith.constant 0 : i32
    %c0_i32_0 = arith.constant 0 : i32
    %c0_i32_1 = arith.constant 0 : i32
    return %c0_i32, %c0_i32_0 : i32, i32
  }
  func.func @transform_13(%arg0: i32) -> (i32, i32) {
    %c0_i32 = arith.constant 0 : i32
    %c0_i32_0 = arith.constant 0 : i32
    %c0_i32_1 = arith.constant 0 : i32
    return %c0_i32, %c0_i32_0 : i32, i32
  }
  func.func @transform_14(%arg0: i32) -> (i32, i32) {
    %c0_i32 = arith.constant 0 : i32
    %c0_i32_0 = arith.constant 0 : i32
    %c0_i32_1 = arith.constant 0 : i32
    return %c0_i32, %c0_i32_0 : i32, i32
  }
  func.func @transform_15(%arg0: i32) -> (i32, i32) {
    %c0_i32 = arith.constant 0 : i32
    %c0_i32_0 = arith.constant 0 : i32
    return %arg0, %c0_i32 : i32, i32
  }
}

</mosaic_0001>

<bundles_post_ra>
// kernel: mlp_denoise_fn.1
= control target key start
LH: loop header
LB: loop body
LE: loop exit
PB: predicated region body
PF: predicated region fallthrough
CT: control target
= control target key end

     0   :  { %s2949_s18 = smov 0   ;;  %s3999_s0 = inlined_call_operand.vmem [shape: f32[256,1], index: 0, kind: input, shape index: {}]   ;;  %s4000_s1 = inlined_call_operand.vmem [shape: f32[256,20], index: 1, kind: input, shape index: {}]   ;;  %s4001_s2 = inlined_call_operand.vmem [shape: f32[1,128], index: 2, kind: input, shape index: {}]   ;;  %s4002_s3 = inlined_call_operand.vmem [shape: f32[1,128], index: 3, kind: input, shape index: {}]   ;;  %s4003_s4 = inlined_call_operand.vmem [shape: bf16[128,128], index: 4, kind: input, shape index: {}]   ;;  %s4004_s5 = inlined_call_operand.vmem [shape: f32[1,128], index: 5, kind: input, shape index: {}]   ;;  %s4005_s6 = inlined_call_operand.vmem [shape: bf16[128,128], index: 6, kind: input, shape index: {}]   ;;  %s4006_s7 = inlined_call_operand.vmem [shape: bf16[20,128], index: 7, kind: input, shape index: {}]   ;;  %s4007_s8 = inlined_call_operand.vmem [shape: f32[1,128], index: 8, kind: input, shape index: {}]   ;;  %s4008_s9 = inlined_call_operand.vmem [shape: bf16[128,128], index: 9, kind: input, shape index: {}]   ;;  %s4009_s10 = inlined_call_operand.vmem [shape: f32[1,128], index: 10, kind: input, shape index: {}]   ;;  %s4010_s11 = inlined_call_operand.vmem [shape: bf16[128,128], index: 11, kind: input, shape index: {}]   ;;  %s4011_s12 = inlined_call_operand.vmem [shape: f32[1,128], index: 12, kind: input, shape index: {}]   ;;  %s4012_s13 = inlined_call_operand.vmem [shape: bf16[128,16], index: 13, kind: input, shape index: {}]   ;;  %s4013_s14 = inlined_call_operand.vmem [shape: f32[1,16], index: 14, kind: input, shape index: {}]   ;;  %s4014_s15 = inlined_call_operand.vmem [shape: f32[256,16], index: 15, kind: output, shape index: {}]  }
   0x1 LB: > { %s2386_s19 = sadd.s32 4294967295, %s2860_s18   ;;  %p2390_p0 = scmp.ge.s32.totalorder %s2860_s18, 1  ;;  %s2860_s18 = sphi %s2949_s18, %s25_s18  }
   0x2   : > { %p449_p1 = scmp.lt.s32.totalorder %s2860_s18, 5 }
   0x4   : > { %p450_p2 = pnand %p2390_p0, %p449_p1 }
   0x6   : > { %453 = sbr.rel (%p450_p2) target bundleno = 1499 (0x5db), region = 80 }
   0xd   : > { %s2391_s20 = sshll.u32 %s2386_s19, 3  ;;  %v2862_v0 = vmov 0   ;;  %v2966_v9 = vld [vmem:[%s4001_s2] ss:$0 sm:$0xff]  ;;  %v4026_v34 = vmov 683565275  }
   0xe   : > { %2747 = vset.pattern.permute.xlu1 %v2862_v0  ;;  %2746 = vset.pattern.permute.xlu0 %v2862_v0  ;;  %p503_p3 = scmp.lt.s32.totalorder %s2391_s20, 31  ;;  %v2971_v10 = vld [vmem:[%s4002_s3] ss:$0 sm:$0xff]  ;;  %v4024_v36 = vmov 2475754826   ;;  %v2749_v57 = vld [vmem:[%s4003_s4 + $0x8] sm:$0xff]  }
   0xf   : > { %v4030_v38 = vmov 2131351028   ;;  %v4022_v40 = vmov 2102212464   ;;  %v2748_v42 = vld [vmem:[%s4003_s4] sm:$0xff]  }
  0x10   : > { %s4077_s20 = smov (!%p503_p3, %s2391_s20), 31  ;;  %v4032_v46 = vmov 920167782   ;;  %v4028_v50 = vmov 1326507024   ;;  %2558 = vmatprep.subr.bf16.mxu0 %v2748_v42 }
  0x11   : > { %s2957_s21 = sshll.u32 %s4077_s20, 3  ;;  %2559 = vmatpush3.bf16.msra.mxu0 %v2748_v42 }
  0x12   : > { %s506_s24 = scalar_lea.vmem %s3999_s0, %s2957_s21  ;;  %2560 = vmatprep.subr.bf16.mxu0 %v2749_v57  ;;  %s512_s25 = scalar_lea.vmem %s4000_s1, %s2957_s21 }
  0x13   : > { %v523_v1 = vld [vmem:[%s506_s24 + $0x10] sm:$0xff]  ;;  %v521_v2 = vld [vmem:[%s506_s24] sm:$0xff]  ;;  %v524_v3 = vld [vmem:[%s506_s24 + $0x18] sm:$0xff] }
  0x14   : > { %542 = vperm.xlu1 %2747, %v523_v1   ;;  %532 = vperm.xlu0 %2746, %v521_v2   ;;  %v522_v4 = vld [vmem:[%s506_s24 + $0x8] sm:$0xff]  ;;  %v525_v6 = vld [vmem:[%s506_s24 + $0x20] sm:$0xff]  ;;  %v528_v7 = vld [vmem:[%s506_s24 + $0x38] sm:$0xff] }
  0x15   : > { %v526_v5 = vld [vmem:[%s506_s24 + $0x28] sm:$0xff]  ;;  %v527_v8 = vld [vmem:[%s506_s24 + $0x30] sm:$0xff]  ;;  %2561 = vmatpush3.bf16.msra.mxu0 %v2749_v57  ;;  %s518_s24 = scalar_lea.vmem %s4014_s15, %s2957_s21 }
  0x18   : > { %547 = vperm.xlu1 %2747, %v524_v3   ;;  %537 = vperm.xlu0 %2746, %v522_v4  }
  0x1c   : > { %557 = vperm.xlu1 %2747, %v526_v5   ;;  %552 = vperm.xlu0 %2746, %v525_v6  }
  0x20   : > { %567 = vperm.xlu1 %2747, %v528_v7   ;;  %562 = vperm.xlu0 %2746, %v527_v8  }
  0x93   : > { %v543_v11 = vpop.permute.xlu1 %542 }
  0x94   : > { %v578_v12 = vmul.f32 %v2966_v9, %v543_v11  ;;  %v2750_v11 = vld [vmem:[%s4003_s4 + $0x10] sm:$0xff]  }
  0x95   : > { %2562 = vmatprep.subr.bf16.mxu0 %v2750_v11 }
  0x96   : > { %v2975_v13 = vsub.f32 %v578_v12, %v2971_v10  ;;  %2563 = vmatpush3.bf16.msra.mxu0 %v2750_v11 }
  0x97   : > { %v548_v14 = vpop.permute.xlu1 %547 }
  0x98   : > { %v808_v15 = vand.u32 2139095040, %v2975_v13  ;;  %v579_v16 = vmul.f32 %v2966_v9, %v548_v14  ;;  %v4021_v19 = vand.u32 2147483647, %v2975_v13 }
  0x9a   : > { %v809_v17 = vshrl.u32 %v808_v15, 23  ;;  %v2980_v18 = vsub.f32 %v579_v16, %v2971_v10  ;;  %v812_v24 = vand.u32 8388607, %v4021_v19 }
  0x9b   : > { %v558_v27 = vpop.permute.xlu1 %557 }
  0x9c   : > { %v2407_v20 = vadd.s32 4294967169, %v809_v17  ;;  %v911_v21 = vand.u32 2139095040, %v2980_v18  ;;  %v813_v30 = vor.u32 8388608, %v812_v24  ;;  %v581_v33 = vmul.f32 %v2966_v9, %v558_v27 }
  0x9e   : > { %v815_v22 = vadd.s32 1, %v2407_v20  ;;  %v912_v23 = vshrl.u32 %v911_v21, 23  ;;  %v853_v4 = vshll.u32 %v813_v30, 8  ;;  %v4019_v20 = vand.u32 2147483647, %v2980_v18 }
  0xa0   : > { %vm816_vm0 = vcmp.gt.s32.totalorder %v815_v22, 0  ;;  %v2411_v26 = vadd.s32 4294967169, %v912_v23 }
  0xa1   : > { %v817_v25 = vsel %vm816_vm0, %v815_v22, 0  ;;  %v533_v22 = vpop.permute.xlu0 %532 }
  0xa2   : > { %v819_v28 = vand.u32 31, %v817_v25  ;;  %v818_v29 = vshrl.u32 %v817_v25, 5  ;;  %v918_v32 = vadd.s32 1, %v2411_v26  ;;  %v3024_v25 = vsub.f32 %v581_v33, %v2971_v10  ;;  %v2751_v26 = vld [vmem:[%s4003_s4 + $0x18] sm:$0xff]  }
  0xa3   : > { %2564 = vmatprep.subr.bf16.mxu0 %v2751_v26 }
  0xa4   : > { %v820_v31 = vsub.s32 32, %v819_v28  ;;  %v822_v35 = vshll.u32 %v4026_v34, %v819_v28  ;;  %v825_v37 = vshll.u32 %v4024_v36, %v819_v28  ;;  %v828_v39 = vshll.u32 %v4030_v38, %v819_v28  ;;  %2565 = vmatpush3.bf16.msra.mxu0 %v2751_v26 }
  0xa5   : > { %v831_v41 = vshll.u32 %v4022_v40, %v819_v28  ;;  %v834_v47 = vshll.u32 %v4032_v46, %v819_v28  ;;  %vm837_vm1 = vcmp.lt.s32.totalorder %v818_v29, 1  ;;  %vm839_vm2 = vcmp.lt.s32.totalorder %v818_v29, 3 }
  0xa6   : > { %v823_v43 = vshrl.u32 %v4024_v36, %v820_v31  ;;  %v826_v44 = vshrl.u32 %v4030_v38, %v820_v31  ;;  %v829_v45 = vshrl.u32 %v4022_v40, %v820_v31  ;;  %v821_v48 = vshrl.u32 %v4026_v34, %v820_v31 }
  0xa7   : > { %v832_v49 = vshrl.u32 %v4032_v46, %v820_v31  ;;  %v835_v51 = vshrl.u32 %v4028_v50, %v820_v31  ;;  %vm840_vm3 = vcmp.lt.s32.totalorder %v818_v29, 4  ;;  %vm919_vm4 = vcmp.gt.s32.totalorder %v918_v32, 0 }
  0xa8   : > { %v824_v52 = vor.u32 %v823_v43, %v822_v35  ;;  %v827_v53 = vor.u32 %v826_v44, %v825_v37  ;;  %v830_v54 = vor.u32 %v829_v45, %v828_v39  ;;  %v920_v1 = vsel %vm919_vm4, %v918_v32, 0  ;;  %v2752_v45 = vld [vmem:[%s4003_s4 + $0x20] sm:$0xff]  }
  0xa9   : > { %v833_v55 = vor.u32 %v832_v49, %v831_v41  ;;  %v836_v56 = vor.u32 %v835_v51, %v834_v47  ;;  %vm838_vm5 = vcmp.lt.s32.totalorder %v818_v29, 2  ;;  %v922_v8 = vand.u32 31, %v920_v1  ;;  %2566 = vmatprep.subr.bf16.mxu0 %v2752_v45 }
  0xaa   : > { %v841_v58 = vsel %vm837_vm1, %v821_v48, %v824_v52  ;;  %v842_v59 = vsel %vm840_vm3, %v830_v54, 2102212464  ;;  %v845_v60 = vsel %vm837_vm1, %v824_v52, %v827_v53  ;;  %v849_v61 = vsel %vm837_vm1, %v827_v53, %v830_v54  ;;  %2567 = vmatpush3.bf16.msra.mxu0 %v2752_v45 }
  0xab   : > { %v843_v62 = vsel %vm839_vm2, %v827_v53, %v842_v59  ;;  %v846_v63 = vsel %vm840_vm3, %v833_v55, 920167782  ;;  %v850_v0 = vsel %vm840_vm3, %v836_v56, 1326507024  ;;  %v3017_v17 = vsub.s32 32, %v922_v8  ;;  %v538_v53 = vpop.permute.xlu0 %537 }
  0xac   : > { %v847_v2 = vsel %vm839_vm2, %v830_v54, %v846_v63  ;;  %v851_v3 = vsel %vm839_vm2, %v833_v55, %v850_v0  ;;  %v844_v5 = vsel %vm838_vm5, %v841_v58, %v843_v62  ;;  %v3020_v23 = vshrl.u32 %v920_v1, 5  ;;  %v2753_v54 = vld [vmem:[%s4003_s4 + $0x28] sm:$0xff]   ;;  %v2754_v58 = vld [vmem:[%s4003_s4 + $0x30] sm:$0xff]  }
  0xad   : > { %v848_v6 = vsel %vm838_vm5, %v845_v60, %v847_v2  ;;  %v852_v7 = vsel %vm838_vm5, %v849_v61, %v851_v3  ;;  %v860_v21 = vmul.u32 %v853_v4, %v844_v5  ;;  %v934_v24 = vshll.u32 %v4022_v40, %v922_v8  ;;  %2568 = vmatprep.subr.bf16.mxu0 %v2753_v54 }
  0xae   : > { %v3010_v12 = vmul.u32.u64.low %v853_v4, %v852_v7  ;;  %v3011_v14 = vmul.u32.u64.high %v853_v4, %v852_v7, %v3010_v12  ;;  %v3013_v15 = vmul.u32.u64.low %v853_v4, %v848_v6  ;;  %v3014_v16 = vmul.u32.u64.high %v853_v4, %v848_v6, %v3013_v15  ;;  %2569 = vmatpush3.bf16.msra.mxu0 %v2753_v54  ;;  %v2755_v4 = vld [vmem:[%s4003_s4 + $0x38] sm:$0xff]  }
  0xaf   : > { %v935_v28 = vshrl.u32 %v4032_v46, %v3017_v17  ;;  %v937_v29 = vshll.u32 %v4032_v46, %v922_v8  ;;  %v926_v30 = vshrl.u32 %v4024_v36, %v3017_v17  ;;  %v929_v31 = vshrl.u32 %v4030_v38, %v3017_v17  ;;  %v553_v3 = vpop.permute.xlu0 %552  ;;  %2570 = vmatprep.subr.bf16.mxu0 %v2754_v58 }
  0xb0   : > { %vm862_vm6 = vc.u32 %v3011_v14, %v3013_v15  ;;  %v863_v27 = vadd.s32 1, %v3014_v16  ;;  %v932_v32 = vshrl.u32 %v4022_v40, %v3017_v17  ;;  %v938_v33 = vshrl.u32 %v4028_v50, %v3017_v17 }
  0xb1   : > { %v925_v37 = vshll.u32 %v4026_v34, %v922_v8  ;;  %v936_v39 = vor.u32 %v935_v28, %v934_v24  ;;  %v928_v42 = vshll.u32 %v4024_v36, %v922_v8  ;;  %v931_v43 = vshll.u32 %v4030_v38, %v922_v8 }
  0xb2   : > { %v864_v35 = vsel %vm862_vm6, %v863_v27, %v3014_v16  ;;  %v939_v44 = vor.u32 %v938_v33, %v937_v29  ;;  %v915_v47 = vand.u32 8388607, %v4019_v20  ;;  %v1117_v48 = vand.u32 2139095040, %v3024_v25  ;;  %2571 = vmatpush3.bf16.msra.mxu0 %v2754_v58 }
  0xb3   : > { %v865_v41 = vadd.s32 %v864_v35, %v860_v21  ;;  %v927_v49 = vor.u32 %v926_v30, %v925_v37  ;;  %v930_v51 = vor.u32 %v929_v31, %v928_v42  ;;  %v933_v52 = vor.u32 %v932_v32, %v931_v43  ;;  %2572 = vmatprep.subr.bf16.mxu0 %v2755_v4 }
  0xb4   : > { %vm943_vm7 = vcmp.lt.s32.totalorder %v3020_v23, 4  ;;  %vm940_vm8 = vcmp.lt.s32.totalorder %v3020_v23, 1  ;;  %vm942_vm9 = vcmp.lt.s32.totalorder %v3020_v23, 3  ;;  %v1118_v59 = vshrl.u32 %v1117_v48, 23 }
  0xb5   : > { %v949_v55 = vsel %vm943_vm7, %v936_v39, 920167782  ;;  %v866_v56 = vadd.s32 536870912, %v865_v41  ;;  %v953_v57 = vsel %vm943_vm7, %v939_v44, 1326507024  ;;  %v916_v60 = vor.u32 8388608, %v915_v47 }
  0xb6   : > { %v948_v61 = vsel %vm940_vm8, %v927_v49, %v930_v51  ;;  %v950_v62 = vsel %vm942_vm9, %v933_v52, %v949_v55  ;;  %v952_v63 = vsel %vm940_vm8, %v930_v51, %v933_v52  ;;  %v954_v0 = vsel %vm942_vm9, %v936_v39, %v953_v57  ;;  %2573 = vmatpush3.bf16.msra.mxu0 %v2755_v4 }
  0xb7   : > { %v2419_v1 = vadd.s32 4294967169, %v1118_v59  ;;  %v3074_v2 = vshrl.u32 %v866_v56, 30  ;;  %vm941_vm10 = vcmp.lt.s32.totalorder %v3020_v23, 2  ;;  %v576_v5 = vmul.f32 %v2966_v9, %v533_v22  ;;  %v568_v59 = vpop.permute.xlu1 %567 }
  0xb8   : > { %v951_v6 = vsel %vm941_vm10, %v948_v61, %v950_v62  ;;  %v955_v8 = vsel %vm941_vm10, %v952_v63, %v954_v0  ;;  %v956_v11 = vshll.u32 %v916_v60, 8  ;;  %v580_v12 = vmul.f32 %v2966_v9, %v553_v3 }
  0xb9   : > { %v1124_v7 = vadd.s32 1, %v2419_v1  ;;  %v868_v16 = vshll.u32 %v3074_v2, 30  ;;  %v3092_v22 = vsub.f32 %v576_v5, %v2971_v10  ;;  %v945_v31 = vsel %vm943_vm7, %v933_v52, 2102212464 }
  0xba   : > { %v3087_v21 = vmul.u32.u64.low %v956_v11, %v951_v6  ;;  %v3088_v24 = vmul.u32.u64.high %v956_v11, %v951_v6, %v3087_v21  ;;  %v3094_v27 = vmul.u32.u64.low %v956_v11, %v955_v8  ;;  %v3095_v28 = vmul.u32.u64.high %v956_v11, %v955_v8, %v3094_v27 }
  0xbb   : > { %vm1125_vm11 = vcmp.gt.s32.totalorder %v1124_v7, 0  ;;  %v3097_v30 = vsub.s32 %v865_v41, %v868_v16  ;;  %v3104_v33 = vsub.f32 %v580_v12, %v2971_v10  ;;  %v602_v35 = vand.u32 2139095040, %v3092_v22 }
  0xbc   : > { %v1126_v26 = vsel %vm1125_vm11, %v1124_v7, 0  ;;  %v924_v37 = vshrl.u32 %v4026_v34, %v3017_v17  ;;  %v577_v39 = vmul.f32 %v2966_v9, %v538_v53  ;;  %v946_v41 = vsel %vm942_vm9, %v930_v51, %v945_v31 }
  0xbd   : > { %v1128_v29 = vand.u32 31, %v1126_v26  ;;  %v871_v43 = vsub.s32 0, %v3097_v30  ;;  %v966_v44 = vadd.s32 1, %v3088_v24  ;;  %v1014_v47 = vand.u32 2139095040, %v3104_v33 }
  0xbe   : > { %v944_v42 = vsel %vm940_vm8, %v924_v37, %v927_v49  ;;  %v603_v48 = vshrl.u32 %v602_v35, 23  ;;  %vm965_vm12 = vc.u32 %v3095_v28, %v3087_v21  ;;  %v3122_v17 = vsub.f32 %v577_v39, %v2971_v10 }
  0xbf   : > { %v3101_v32 = vsub.s32 32, %v1128_v29  ;;  %v947_v51 = vsel %vm941_vm10, %v944_v42, %v946_v41  ;;  %v4016_v52 = vand.u32 2147483647, %v3024_v25  ;;  %v3129_v53 = vshrl.u32 %v1126_v26, 5 }
  0xc0   : > { %v1140_v54 = vshll.u32 %v4022_v40, %v1128_v29  ;;  %v1143_v58 = vshll.u32 %v4032_v46, %v1128_v29  ;;  %v2408_v23 = vmin.u32 %v871_v43, %v3097_v30  ;;  %v967_v60 = vsel %vm965_vm12, %v966_v44, %v3088_v24 }
  0xc1   : > { %v1141_v45 = vshrl.u32 %v4032_v46, %v3101_v32  ;;  %v1144_v49 = vshrl.u32 %v4028_v50, %v3101_v32  ;;  %v1132_v55 = vshrl.u32 %v4024_v36, %v3101_v32  ;;  %v1135_v56 = vshrl.u32 %v4030_v38, %v3101_v32 }
  0xc2   : > { %v1138_v57 = vshrl.u32 %v4022_v40, %v3101_v32  ;;  %v1015_v62 = vshrl.u32 %v1014_v47, 23  ;;  %v1131_v63 = vshll.u32 %v4026_v34, %v1128_v29  ;;  %v1134_v0 = vshll.u32 %v4024_v36, %v1128_v29 }
  0xc3   : > { %v1142_v61 = vor.u32 %v1141_v45, %v1140_v54  ;;  %v1137_v1 = vshll.u32 %v4030_v38, %v1128_v29  ;;  %v1145_v3 = vor.u32 %v1144_v49, %v1143_v58  ;;  %v963_v4 = vmul.u32 %v956_v11, %v947_v51  ;;  %v563_v51 = vpop.permute.xlu0 %562 }
  0xc4   : > { %v705_v5 = vand.u32 2139095040, %v3122_v17  ;;  %v1121_v6 = vand.u32 8388607, %v4016_v52  ;;  %v583_v7 = vmul.f32 %v2966_v9, %v568_v59  ;;  %v1133_v8 = vor.u32 %v1132_v55, %v1131_v63 }
  0xc5   : > { %v1136_v12 = vor.u32 %v1135_v56, %v1134_v0  ;;  %v1139_v16 = vor.u32 %v1138_v57, %v1137_v1  ;;  %vm1149_vm13 = vcmp.lt.s32.totalorder %v3129_v53, 4  ;;  %v3149_v24 = vadd.s32 %v967_v60, %v963_v4 }
  0xc6   : > { %v1155_v26 = vsel %vm1149_vm13, %v1142_v61, 920167782  ;;  %v2415_v27 = vadd.s32 4294967169, %v1015_v62  ;;  %v873_v29 = vclz %v2408_v23  ;;  %v2399_v11 = vadd.s32 4294967169, %v603_v48 }
  0xc7   : > { %v1159_v31 = vsel %vm1149_vm13, %v1145_v3, 1326507024  ;;  %v706_v35 = vshrl.u32 %v705_v5, 23  ;;  %v1122_v37 = vor.u32 8388608, %v1121_v6  ;;  %vm1146_vm14 = vcmp.lt.s32.totalorder %v3129_v53, 1 }
  0xc8   : > { %vm1148_vm15 = vcmp.lt.s32.totalorder %v3129_v53, 3  ;;  %v1154_v39 = vsel %vm1146_vm14, %v1133_v8, %v1136_v12  ;;  %v4017_v41 = vand.u32 2147483647, %v3104_v33  ;;  %v3163_v43 = vsub.f32 %v583_v7, %v2971_v10 }
  0xc9   : > { %v1156_v42 = vsel %vm1148_vm15, %v1139_v16, %v1155_v26  ;;  %v969_v44 = vadd.s32 536870912, %v3149_v24  ;;  %v1158_v45 = vsel %vm1146_vm14, %v1136_v12, %v1139_v16  ;;  %v1160_v47 = vsel %vm1148_vm15, %v1142_v61, %v1159_v31 }
  0xca   : > { %v1021_v48 = vadd.s32 1, %v2415_v27  ;;  %v2409_v49 = vadd.s32 4294967294, %v873_v29  ;;  %vm1147_vm0 = vcmp.lt.s32.totalorder %v3129_v53, 2  ;;  %v3171_v54 = vadd.s32 1, %v2399_v11 }
  0xcb   : > { %v3173_v55 = vadd.s32 4294967169, %v706_v35  ;;  %v1157_v56 = vsel %vm1147_vm0, %v1154_v39, %v1156_v42  ;;  %v1161_v57 = vsel %vm1147_vm0, %v1158_v45, %v1160_v47  ;;  %v3179_v58 = vshll.u32 %v1122_v37, 8 }
  0xcc   : > { %vm1022_vm1 = vcmp.gt.s32.totalorder %v1021_v48, 0  ;;  %v1323_v23 = vand.u32 2139095040, %v3163_v43  ;;  %v3182_v60 = vshrl.u32 %v969_v44, 30  ;;  %v1018_v61 = vand.u32 8388607, %v4017_v41 }
  0xcd   : > { %v1023_v59 = vsel %vm1022_vm1, %v1021_v48, 0  ;;  %v582_v63 = vmul.f32 %v2966_v9, %v563_v51  ;;  %vm2410_vm2 = vcmp.lt.s32.totalorder %v2409_v49, 0  ;;  %v1130_v0 = vshrl.u32 %v4026_v34, %v3101_v32 }
  0xce   : > { %v1025_v62 = vand.u32 31, %v1023_v59  ;;  %v3190_v1 = vmul.u32.u64.low %v3179_v58, %v1157_v56  ;;  %v3191_v3 = vmul.u32.u64.high %v3179_v58, %v1157_v56, %v3190_v1  ;;  %v1151_v4 = vsel %vm1149_vm13, %v1139_v16, 2102212464 }
  0xcf   : > { %v3197_v5 = vmul.u32.u64.low %v3179_v58, %v1161_v57  ;;  %v3198_v6 = vmul.u32.u64.high %v3179_v58, %v1161_v57, %v3197_v5  ;;  %v3202_v26 = vshrl.u32 %v1023_v59, 5  ;;  %v1324_v27 = vshrl.u32 %v1323_v23, 23 }
  0xd0   : > { %v3200_v7 = vsub.s32 32, %v1025_v62  ;;  %v1028_v9 = vshll.u32 %v4026_v34, %v1025_v62  ;;  %v1031_v32 = vshll.u32 %v4024_v36, %v1025_v62  ;;  %v1034_v16 = vshll.u32 %v4030_v38, %v1025_v62 }
  0xd1   : > { %v1037_v31 = vshll.u32 %v4022_v40, %v1025_v62  ;;  %v1040_v39 = vshll.u32 %v4032_v46, %v1025_v62  ;;  %vm610_vm3 = vcmp.gt.s32.totalorder %v3171_v54, 0  ;;  %v1150_v44 = vsel %vm1146_vm14, %v1130_v0, %v1133_v8 }
  0xd2   : > { %v1029_v29 = vshrl.u32 %v4024_v36, %v3200_v7  ;;  %v1032_v11 = vshrl.u32 %v4030_v38, %v3200_v7  ;;  %v1035_v35 = vshrl.u32 %v4022_v40, %v3200_v7  ;;  %v1038_v37 = vshrl.u32 %v4032_v46, %v3200_v7 }
  0xd3   : > { %v1041_v42 = vshrl.u32 %v4028_v50, %v3200_v7  ;;  %v1152_v45 = vsel %vm1148_vm15, %v1136_v12, %v1151_v4  ;;  %v2427_v59 = vadd.s32 4294967169, %v1324_v27  ;;  %v3225_v23 = vsel %vm2410_vm2, 0, %v2409_v49 }
  0xd4   : > { %v1030_v47 = vor.u32 %v1029_v29, %v1028_v9  ;;  %v1033_v48 = vor.u32 %v1032_v11, %v1031_v32  ;;  %v1036_v51 = vor.u32 %v1035_v35, %v1034_v16  ;;  %v1039_v56 = vor.u32 %v1038_v37, %v1037_v31 }
  0xd5   : > { %v1042_v57 = vor.u32 %v1041_v42, %v1040_v39  ;;  %v971_v62 = vshll.u32 %v3182_v60, 30  ;;  %v1019_v5 = vor.u32 8388608, %v1018_v61  ;;  %vm1043_vm4 = vcmp.lt.s32.totalorder %v3202_v26, 1 }
  0xd6   : > { %v1153_v8 = vsel %vm1147_vm0, %v1150_v44, %v1152_v45  ;;  %v1172_v0 = vadd.s32 1, %v3191_v3  ;;  %vm1046_vm5 = vcmp.lt.s32.totalorder %v3202_v26, 4  ;;  %v1051_v12 = vsel %vm1043_vm4, %v1030_v47, %v1033_v48 }
  0xd7   : > { %vm1171_vm6 = vc.u32 %v3198_v6, %v3190_v1  ;;  %vm1045_vm7 = vcmp.lt.s32.totalorder %v3202_v26, 3  ;;  %v1052_v49 = vsel %vm1046_vm5, %v1039_v56, 920167782  ;;  %v1055_v61 = vsel %vm1043_vm4, %v1033_v48, %v1036_v51 }
  0xd8   : > { %vm1044_vm8 = vcmp.lt.s32.totalorder %v3202_v26, 2  ;;  %v1053_v53 = vsel %vm1045_vm7, %v1036_v51, %v1052_v49  ;;  %v1056_v4 = vsel %vm1046_vm5, %v1042_v57, 1326507024  ;;  %v1330_v9 = vadd.s32 1, %v2427_v59 }
  0xd9   : > { %v3248_v32 = vsub.s32 %v3149_v24, %v971_v62  ;;  %v1054_v27 = vsel %vm1044_vm8, %v1051_v12, %v1053_v53  ;;  %v1057_v29 = vsel %vm1045_vm7, %v1039_v56, %v1056_v4  ;;  %v3254_v11 = vshll.u32 %v1019_v5, 8 }
  0xda   : > { %v877_v16 = vsub.s32 32, %v3225_v23  ;;  %v1173_v31 = vsel %vm1171_vm6, %v1172_v0, %v3191_v3  ;;  %v1058_v35 = vsel %vm1044_vm8, %v1055_v61, %v1057_v29  ;;  %vm1331_vm9 = vcmp.gt.s32.totalorder %v1330_v9, 0 }
  0xdb   : > { %v1169_v37 = vmul.u32 %v3179_v58, %v1153_v8  ;;  %v3262_v24 = vmul.u32.u64.low %v3254_v11, %v1054_v27  ;;  %v3263_v39 = vmul.u32.u64.high %v3254_v11, %v1054_v27, %v3262_v24  ;;  %v1332_v42 = vsel %vm1331_vm9, %v1330_v9, 0 }
  0xdc   : > { %v881_v44 = vsub.s32 4294967266, %v3225_v23  ;;  %v4015_v45 = vand.u32 2147483647, %v3163_v43  ;;  %v1334_v56 = vand.u32 31, %v1332_v42  ;;  %v3269_v57 = vsub.f32 %v582_v63, %v2971_v10 }
  0xdd   : > { %v861_v3 = vadd.s32 %v3013_v15, %v3011_v14  ;;  %v3273_v59 = vadd.s32 %v1173_v31, %v1169_v37  ;;  %v3276_v58 = vmul.u32.u64.low %v3254_v11, %v1058_v35  ;;  %v3277_v62 = vmul.u32.u64.high %v3254_v11, %v1058_v35, %v3276_v58 }
  0xde   : > { %v3282_v5 = vsel %vm610_vm3, %v3171_v54, 0  ;;  %v1048_v8 = vsel %vm1046_vm5, %v1036_v51, 2102212464  ;;  %v1335_v0 = vsub.s32 32, %v1334_v56  ;;  %v974_v63 = vsub.s32 0, %v3248_v32 }
  0xdf   : > { %v3286_v10 = vshrl.u32 %v861_v3, %v877_v16  ;;  %v3290_v14 = vadd.s32 1, %v3173_v55  ;;  %v1027_v15 = vshrl.u32 %v4026_v34, %v3200_v7  ;;  %v3294_v12 = vadd.s32 127, %v881_v44 }
  0xe0   : > { %v1327_v54 = vand.u32 8388607, %v4015_v45  ;;  %v1338_v49 = vshrl.u32 %v4024_v36, %v1335_v0  ;;  %v1220_v51 = vand.u32 2139095040, %v3269_v57  ;;  %v1175_v61 = vadd.s32 536870912, %v3273_v59 }
  0xe1   : > { %v1047_v53 = vsel %vm1043_vm4, %v1027_v15, %v1030_v47  ;;  %v1049_v55 = vsel %vm1045_vm7, %v1033_v48, %v1048_v8  ;;  %v3305_v4 = vshrl.u32 %v1332_v42, 5  ;;  %v1337_v7 = vshll.u32 %v4026_v34, %v1334_v56 }
  0xe2   : > { %v1340_v9 = vshll.u32 %v4024_v36, %v1334_v56  ;;  %v1341_v27 = vshrl.u32 %v4030_v38, %v1335_v0  ;;  %v1344_v29 = vshrl.u32 %v4022_v40, %v1335_v0  ;;  %v1069_v16 = vadd.s32 1, %v3263_v39 }
  0xe3   : > { %v1343_v31 = vshll.u32 %v4030_v38, %v1334_v56  ;;  %v1346_v35 = vshll.u32 %v4022_v40, %v1334_v56  ;;  %v1347_v47 = vshrl.u32 %v4032_v46, %v1335_v0  ;;  %vm713_vm10 = vcmp.gt.s32.totalorder %v3290_v14, 0 }
  0xe4   : > { %v1339_v48 = vor.u32 %v1338_v49, %v1337_v7  ;;  %v1342_v37 = vor.u32 %v1341_v27, %v1340_v9  ;;  %v1349_v42 = vshll.u32 %v4032_v46, %v1334_v56  ;;  %v1350_v44 = vshrl.u32 %v4028_v50, %v1335_v0 }
  0xe5   : > { %vm1068_vm11 = vc.u32 %v3277_v62, %v3262_v24  ;;  %v1328_v3 = vor.u32 8388608, %v1327_v54  ;;  %v1345_v58 = vor.u32 %v1344_v29, %v1343_v31  ;;  %v1348_v8 = vor.u32 %v1347_v47, %v1346_v35 }
  0xe6   : > { %v883_v15 = vshll.u32 %v3294_v12, 23  ;;  %v2412_v45 = vmin.u32 %v974_v63, %v3248_v32  ;;  %v1050_v52 = vsel %vm1044_vm8, %v1047_v53, %v1049_v55  ;;  %v1351_v41 = vor.u32 %v1350_v44, %v1349_v42 }
  0xe7   : > { %v3324_v49 = vshrl.u32 %v1175_v61, 30  ;;  %vm1352_vm12 = vcmp.lt.s32.totalorder %v3305_v4, 1  ;;  %vm1355_vm13 = vcmp.lt.s32.totalorder %v3305_v4, 4  ;;  %v1221_v56 = vshrl.u32 %v1220_v51, 23 }
  0xe8   : > { %v1070_v7 = vsel %vm1068_vm11, %v1069_v16, %v3263_v39  ;;  %vm1354_vm14 = vcmp.lt.s32.totalorder %v3305_v4, 3  ;;  %v1360_v12 = vsel %vm1352_vm12, %v1339_v48, %v1342_v37  ;;  %v1361_v54 = vsel %vm1355_vm13, %v1348_v8, 920167782 }
  0xe9   : > { %4039 = vst [vmem:[#allocation2_spill] sm:$0xff] %v3324_v49  ;;  %v1066_v63 = vmul.u32 %v3254_v11, %v1050_v52  ;;  %vm1353_vm15 = vcmp.lt.s32.totalorder %v3305_v4, 2  ;;  %v1362_v26 = vsel %vm1354_vm14, %v1345_v58, %v1361_v54  ;;  %v1368_v61 = vshll.u32 %v1328_v3, 8  ;;  %v2756_v11 = vld [vmem:[%s4006_s7] sm:$0xff]  }
  0xea   : > { %v1357_v53 = vsel %vm1355_vm13, %v1345_v58, 2102212464  ;;  %v1363_v51 = vsel %vm1353_vm15, %v1360_v12, %v1362_v26  ;;  %v1364_v39 = vsel %vm1352_vm12, %v1342_v37, %v1345_v58  ;;  %v1365_v55 = vsel %vm1355_vm13, %v1351_v41, 1326507024  ;;  %2582 = vmatprep.subr.bf16.mxu1 %v2756_v11 }
  0xeb   : > { %v976_v9 = vclz %v2412_v45  ;;  %v3340_v27 = vadd.s32 %v1070_v7, %v1066_v63  ;;  %v1336_v29 = vshrl.u32 %v4026_v34, %v1335_v0  ;;  %v1366_v52 = vsel %vm1354_vm14, %v1348_v8, %v1365_v55  ;;  %2583 = vmatpush3.bf16.msra.mxu1 %v2756_v11 }
  0xec   : > { %v1367_v16 = vsel %vm1353_vm15, %v1364_v39, %v1366_v52  ;;  %v3350_v31 = vmul.u32.u64.low %v1368_v61, %v1363_v51  ;;  %v3351_v35 = vmul.u32.u64.high %v1368_v61, %v1363_v51, %v3350_v31  ;;  %v2423_v41 = vadd.s32 4294967169, %v1221_v56 }
  0xed   : > { %v1356_v45 = vsel %vm1352_vm12, %v1336_v29, %v1339_v48  ;;  %v1358_v0 = vsel %vm1354_vm14, %v1342_v37, %v1357_v53  ;;  %v3358_v47 = vmul.u32.u64.low %v1368_v61, %v1367_v16  ;;  %v3359_v42 = vmul.u32.u64.high %v1368_v61, %v1367_v16, %v3358_v47 }
  0xee   : > { %v878_v44 = vshll.u32 %v3097_v30, %v3225_v23  ;;  %v1177_v3 = vshll.u32 %v3324_v49, 30  ;;  %v1227_v58 = vadd.s32 1, %v2423_v41  ;;  %v3365_v8 = vand.u32 31, %v3282_v5 }
  0xef   : > { %v3370_v48 = vsel %vm713_vm10, %v3290_v14, 0  ;;  %v1072_v37 = vadd.s32 536870912, %v3340_v27  ;;  %v4020_v56 = vand.u32 2147483647, %v3092_v22  ;;  %v1359_v30 = vsel %vm1353_vm15, %v1356_v45, %v1358_v0 }
  0xf0   : > { %v3375_v7 = vor.u32 %v3286_v10, %v878_v44  ;;  %v1378_v23 = vadd.s32 1, %v3351_v35  ;;  %vm1228_vm0 = vcmp.gt.s32.totalorder %v1227_v58, 0  ;;  %v3380_v12 = vor.u32 4788187, %v883_v15 }
  0xf1   : > { %v2413_v54 = vadd.s32 4294967294, %v976_v9  ;;  %vm1377_vm1 = vc.u32 %v3359_v42, %v3350_v31  ;;  %v1229_v14 = vsel %vm1228_vm0, %v1227_v58, 0  ;;  %v3385_v63 = vsub.s32 %v3273_v59, %v1177_v3 }
  0xf2   : > { %v1379_v26 = vsel %vm1377_vm1, %v1378_v23, %v3351_v35  ;;  %v4018_v10 = vand.u32 2147483647, %v3269_v57  ;;  %v1231_v53 = vand.u32 31, %v1229_v14  ;;  %v3389_v4 = vshrl.u32 %v1072_v37, 30 }
  0xf3   : > { %v1375_v51 = vmul.u32 %v1368_v61, %v1359_v30  ;;  %v3393_v15 = vand.u32 8388607, %v4020_v56  ;;  %v3396_v39 = vshrl.u32 %v3282_v5, 5  ;;  %v3399_v55 = vsub.s32 32, %v3365_v8 }
  0xf4   : > { %v3402_v59 = vand.u32 31, %v3370_v48  ;;  %v1232_v9 = vsub.s32 32, %v1231_v53  ;;  %vm2414_vm2 = vcmp.lt.s32.totalorder %v2413_v54, 0  ;;  %v1180_v11 = vsub.s32 0, %v3385_v63 }
  0xf5   : > { %v3406_v61 = vadd.s32 %v1379_v26, %v1375_v51  ;;  %v1224_v5 = vand.u32 8388607, %v4018_v10  ;;  %v1074_v41 = vshll.u32 %v3389_v4, 30  ;;  %v1234_v45 = vshll.u32 %v4026_v34, %v1231_v53 }
  0xf6   : > { %v1235_v16 = vshrl.u32 %v4024_v36, %v1232_v9  ;;  %v1238_v35 = vshrl.u32 %v4030_v38, %v1232_v9  ;;  %v1237_v0 = vshll.u32 %v4024_v36, %v1231_v53  ;;  %v1241_v47 = vshrl.u32 %v4022_v40, %v1232_v9 }
  0xf7   : > { %v1230_v44 = vshrl.u32 %v1229_v14, 5  ;;  %v1240_v3 = vshll.u32 %v4030_v38, %v1231_v53  ;;  %v1243_v58 = vshll.u32 %v4022_v40, %v1231_v53  ;;  %v1244_v37 = vshrl.u32 %v4032_v46, %v1232_v9 }
  0xf8   : > { %v3420_v30 = vsel %vm2414_vm2, 0, %v2413_v54  ;;  %v1381_v23 = vadd.s32 536870912, %v3406_v61  ;;  %v1236_v26 = vor.u32 %v1235_v16, %v1234_v45  ;;  %v1239_v51 = vor.u32 %v1238_v35, %v1237_v0 }
  0xf9   : > { %v1242_v10 = vor.u32 %v1241_v47, %v1240_v3  ;;  %v1245_v20 = vor.u32 %v1244_v37, %v1243_v58  ;;  %v1246_v56 = vshll.u32 %v4032_v46, %v1231_v53  ;;  %v1247_v19 = vshrl.u32 %v4028_v50, %v1232_v9 }
  0xfa   : > { %v3426_v14 = vmin.u32 %v1180_v11, %v3385_v63  ;;  %v3429_v52 = vsub.s32 %v3340_v27, %v1074_v41  ;;  %v1225_v29 = vor.u32 8388608, %v1224_v5  ;;  %v616_v54 = vshll.u32 %v4026_v34, %v3365_v8 }
  0xfb   : > { %v1248_v40 = vor.u32 %v1247_v19, %v1246_v56  ;;  %vm1249_vm3 = vcmp.lt.s32.totalorder %v1230_v44, 1  ;;  %v617_v16 = vshrl.u32 %v4024_v36, %v3399_v55  ;;  %v619_v53 = vshll.u32 %v4024_v36, %v3365_v8 }
  0xfc   : > { %v3437_v35 = vshrl.u32 %v1381_v23, 30  ;;  %vm1251_vm4 = vcmp.lt.s32.totalorder %v1230_v44, 3  ;;  %vm1252_vm5 = vcmp.lt.s32.totalorder %v1230_v44, 4  ;;  %v1257_v11 = vsel %vm1249_vm3, %v1236_v26, %v1239_v51 }
  0xfd   : > { %v1254_v27 = vsel %vm1252_vm5, %v1242_v10, 2102212464  ;;  %v1258_v41 = vsel %vm1252_vm5, %v1245_v20, 920167782  ;;  %v1261_v5 = vsel %vm1249_vm3, %v1239_v51, %v1242_v10  ;;  %v1262_v45 = vsel %vm1252_vm5, %v1248_v40, 1326507024 }
  0xfe   : > { %4040 = vst [vmem:[#allocation3_spill] sm:$0xff] %v3437_v35  ;;  %v1233_v19 = vshrl.u32 %v4026_v34, %v1232_v9  ;;  %vm1250_vm6 = vcmp.lt.s32.totalorder %v1230_v44, 2  ;;  %v1259_v56 = vsel %vm1251_vm4, %v1242_v10, %v1258_v41  ;;  %v620_v0 = vshrl.u32 %v4030_v38, %v3399_v55 }
  0xff   : > { %v1260_v47 = vsel %vm1250_vm6, %v1257_v11, %v1259_v56  ;;  %v1263_v3 = vsel %vm1251_vm4, %v1245_v20, %v1262_v45  ;;  %v1265_v58 = vshll.u32 %v1225_v29, 8  ;;  %v4041_v37 = vmov 2102212464  }
 0x100   : > { %v623_v23 = vshrl.u32 %v4041_v37, %v3399_v55  ;;  %v1383_v36 = vshll.u32 %v3437_v35, 30  ;;  %v1253_v40 = vsel %vm1249_vm3, %v1233_v19, %v1236_v26  ;;  %v1255_v9 = vsel %vm1251_vm4, %v1239_v51, %v1254_v27 }
 0x101   : > { %v1264_v34 = vsel %vm1250_vm6, %v1261_v5, %v1263_v3  ;;  %v3456_v50 = vmul.u32.u64.low %v1265_v58, %v1260_v47  ;;  %v3457_v38 = vmul.u32.u64.high %v1265_v58, %v1260_v47, %v3456_v50  ;;  %v1077_v20 = vsub.s32 0, %v3429_v52 }
 0x102   : > { %v3453_v10 = vmul.u32.u64.low %v1265_v58, %v1264_v34  ;;  %v3454_v41 = vmul.u32.u64.high %v1265_v58, %v1264_v34, %v3453_v10  ;;  %v618_v29 = vor.u32 %v617_v16, %v616_v54  ;;  %v625_v11 = vshll.u32 %v4041_v37, %v3365_v8 }
 0x103   : > { %v626_v26 = vshrl.u32 %v4032_v46, %v3399_v55  ;;  %v1256_v51 = vsel %vm1250_vm6, %v1253_v40, %v1255_v9  ;;  %v621_v27 = vor.u32 %v620_v0, %v619_v53  ;;  %v4042_v5 = vmov 2131351028  }
 0x104   : > { %v622_v34 = vshll.u32 %v4042_v5, %v3365_v8  ;;  %v4043_v45 = vmov 1326507024   ;;  %v1182_v56 = vclz %v3426_v14  ;;  %v607_v47 = vor.u32 8388608, %v3393_v15 }
 0x105   : > { %v629_v19 = vshrl.u32 %v4043_v45, %v3399_v55  ;;  %v627_v54 = vor.u32 %v626_v26, %v625_v11  ;;  %v628_v16 = vshll.u32 %v4032_v46, %v3365_v8  ;;  %v3475_v3 = vsub.s32 %v3406_v61, %v1383_v36 }
 0x106   : > { %vm1274_vm7 = vc.u32 %v3454_v41, %v3456_v50  ;;  %v1275_v44 = vadd.s32 1, %v3457_v38  ;;  %v624_v53 = vor.u32 %v623_v23, %v622_v34  ;;  %v1272_v0 = vmul.u32 %v1265_v58, %v1256_v51 }
 0x107   : > { %v630_v40 = vor.u32 %v629_v19, %v628_v16  ;;  %vm631_vm8 = vcmp.lt.s32.totalorder %v3396_v39, 1  ;;  %vm634_vm9 = vcmp.lt.s32.totalorder %v3396_v39, 4  ;;  %v2416_v15 = vmin.u32 %v1077_v20, %v3429_v52 }
 0x108   : > { %v1276_v14 = vsel %vm1274_vm7, %v1275_v44, %v3457_v38  ;;  %v639_v36 = vsel %vm631_vm8, %v618_v29, %v621_v27  ;;  %v640_v8 = vsel %vm634_vm9, %v627_v54, 920167782  ;;  %v984_v61 = vsub.s32 4294967266, %v3420_v30 }
 0x109   : > { %v1277_v9 = vadd.s32 %v1276_v14, %v1272_v0  ;;  %vm632_vm10 = vcmp.lt.s32.totalorder %v3396_v39, 2  ;;  %vm633_vm11 = vcmp.lt.s32.totalorder %v3396_v39, 3  ;;  %v636_v58 = vsel %vm634_vm9, %v624_v53, 2102212464 }
 0x10a   : > { %v641_v23 = vsel %vm633_vm11, %v624_v53, %v640_v8  ;;  %v643_v10 = vsel %vm631_vm8, %v621_v27, %v624_v53  ;;  %v644_v11 = vsel %vm634_vm9, %v630_v40, 1326507024  ;;  %v1386_v20 = vsub.s32 0, %v3475_v3 }
 0x10b   : > { %v1278_v38 = vadd.s32 536870912, %v1277_v9  ;;  %v4044_v26 = vmov 683565275   ;;  %v642_v34 = vsel %vm632_vm10, %v639_v36, %v641_v23  ;;  %v2421_v19 = vadd.s32 4294967294, %v1182_v56 }
 0x10c   : > { %v615_v51 = vshrl.u32 %v4044_v26, %v3399_v55  ;;  %v1079_v16 = vclz %v2416_v15  ;;  %v645_v44 = vsel %vm633_vm11, %v627_v54, %v644_v11  ;;  %v647_v0 = vshll.u32 %v607_v47, 8 }
 0x10d   : > { %v3496_v14 = vshrl.u32 %v1278_v38, 30  ;;  %v637_v53 = vsel %vm633_vm11, %v621_v27, %v636_v58  ;;  %v646_v40 = vsel %vm632_vm10, %v643_v10, %v645_v44  ;;  %v3510_v56 = vshrl.u32 %v3370_v48, 5 }
 0x10e   : > { %v635_v8 = vsel %vm631_vm8, %v615_v51, %v618_v29  ;;  %v3502_v46 = vmul.u32.u64.low %v647_v0, %v646_v40  ;;  %v3503_v35 = vmul.u32.u64.high %v647_v0, %v646_v40, %v3502_v46  ;;  %v3513_v47 = vsub.s32 32, %v3402_v59 }
 0x10f   : > { %v3505_v55 = vmul.u32.u64.low %v647_v0, %v642_v34  ;;  %v3506_v49 = vmul.u32.u64.high %v647_v0, %v642_v34, %v3505_v55  ;;  %v2428_v54 = vmin.u32 %v1386_v20, %v3475_v3  ;;  %v1280_v29 = vshll.u32 %v3496_v14, 30 }
 0x110   : > { %v4045_v27 = vand.u32 2147483647, %v3380_v12  ;;  %v4046_v15 = vcvt.s32.f32 %v3375_v7  ;;  %v964_v46 = vadd.s32 %v3087_v21, %v3095_v28  ;;  %v980_v58 = vsub.s32 32, %v3420_v30 }
 0x111   : > { %v638_v48 = vsel %vm632_vm10, %v635_v8, %v637_v53  ;;  %v981_v23 = vshll.u32 %v3248_v32, %v3420_v30  ;;  %v3530_v10 = vadd.s32 127, %v984_v61  ;;  %vm2422_vm12 = vcmp.lt.s32.totalorder %v2421_v19, 0 }
 0x112   : > { %v3521_v36 = vmul.f32 %v4046_v15, %v4045_v27  ;;  %v3532_v11 = vsub.s32 %v1277_v9, %v1280_v29  ;;  %v2417_v12 = vadd.s32 4294967294, %v1079_v16  ;;  %vm656_vm13 = vc.u32 %v3503_v35, %v3505_v55 }
 0x113   : > { %v657_v7 = vadd.s32 1, %v3506_v49  ;;  %v4038_v21 = vand.u32 2147483647, %v3122_v17  ;;  %v1388_v28 = vclz %v2428_v54  ;;  %v654_v20 = vmul.u32 %v647_v0, %v638_v48 }
 0x114   : > { %v1283_v39 = vsub.s32 0, %v3532_v11  ;;  %v723_v38 = vshrl.u32 %v4042_v5, %v3513_v47  ;;  %v4047_v9 = vmov 2475754826   ;;  %v725_v34 = vshll.u32 %v4042_v5, %v3402_v59 }
 0x115   : > { %v658_v61 = vsel %vm656_vm13, %v657_v7, %v3506_v49  ;;  %v722_v51 = vshll.u32 %v4047_v9, %v3402_v59  ;;  %v726_v16 = vshrl.u32 %v4041_v37, %v3513_v47  ;;  %v728_v0 = vshll.u32 %v4041_v37, %v3402_v59 }
 0x116   : > { %v2424_v44 = vmin.u32 %v1283_v39, %v3532_v11  ;;  %v659_v8 = vadd.s32 %v658_v61, %v654_v20  ;;  %v4048_v53 = vmov 920167782   ;;  %v709_v49 = vand.u32 8388607, %v4038_v21 }
 0x117   : > { %v729_v40 = vshrl.u32 %v4048_v53, %v3513_v47  ;;  %v720_v54 = vshrl.u32 %v4047_v9, %v3513_v47  ;;  %v731_v5 = vshll.u32 %v4048_v53, %v3402_v59  ;;  %v732_v29 = vshrl.u32 %v4043_v45, %v3513_v47 }
 0x118   : > { %v660_v27 = vadd.s32 536870912, %v659_v8  ;;  %v724_v15 = vor.u32 %v723_v38, %v722_v51  ;;  %v727_v48 = vor.u32 %v726_v16, %v725_v34  ;;  %v3562_v37 = vsel %vm2422_vm12, 0, %v2421_v19 }
 0x119   : > { %v730_v7 = vor.u32 %v729_v40, %v728_v0  ;;  %vm2418_vm14 = vcmp.lt.s32.totalorder %v2417_v12, 0  ;;  %v719_v39 = vshll.u32 %v4044_v26, %v3402_v59  ;;  %v733_v20 = vor.u32 %v732_v29, %v731_v5 }
 0x11a   : > { %v2429_v61 = vadd.s32 4294967294, %v1388_v28  ;;  %v1285_v9 = vclz %v2424_v44  ;;  %v3566_v21 = vshrl.u32 %v660_v27, 30  ;;  %vm737_vm15 = vcmp.lt.s32.totalorder %v3510_v56, 4 }
 0x11b   : > { %v710_v53 = vor.u32 8388608, %v709_v49  ;;  %v721_v45 = vor.u32 %v720_v54, %v719_v39  ;;  %vm734_vm0 = vcmp.lt.s32.totalorder %v3510_v56, 1  ;;  %v747_v38 = vsel %vm737_vm15, %v733_v20, 1326507024 }
 0x11c   : > { %v662_v19 = vshll.u32 %v3566_v21, 30  ;;  %vm736_vm1 = vcmp.lt.s32.totalorder %v3510_v56, 3  ;;  %v743_v59 = vsel %vm737_vm15, %v730_v7, 920167782  ;;  %v746_v28 = vsel %vm734_vm0, %v724_v15, %v727_v48 }
 0x11d   : > { %v986_v51 = vshll.u32 %v3530_v10, 23  ;;  %v1190_v34 = vsub.s32 4294967266, %v3562_v37  ;;  %v3581_v16 = vsel %vm2418_vm14, 0, %v2417_v12  ;;  %v748_v44 = vsel %vm736_vm1, %v730_v7, %v747_v38 }
 0x11e   : > { %vm2430_vm2 = vcmp.lt.s32.totalorder %v2429_v61, 0  ;;  %v2425_v0 = vadd.s32 4294967294, %v1285_v9  ;;  %v3585_v40 = vsub.s32 %v659_v8, %v662_v19  ;;  %vm735_vm3 = vcmp.lt.s32.totalorder %v3510_v56, 2 }
 0x11f   : > { %v742_v49 = vsel %vm734_vm0, %v721_v45, %v724_v15  ;;  %v744_v10 = vsel %vm736_vm1, %v727_v48, %v743_v59  ;;  %v749_v54 = vsel %vm735_vm3, %v746_v28, %v748_v44  ;;  %v750_v12 = vshll.u32 %v710_v53, 8 }
 0x120   : > { %v889_v5 = vxor.u32 2147483648, %v3521_v36  ;;  %v982_v29 = vshrl.u32 %v964_v46, %v980_v58  ;;  %v1087_v27 = vsub.s32 4294967266, %v3581_v16  ;;  %v665_v8 = vsub.s32 0, %v3585_v40 }
 0x121   : > { %v1186_v7 = vsub.s32 32, %v3562_v37  ;;  %v739_v39 = vsel %vm737_vm15, %v727_v48, 2102212464  ;;  %v3600_v20 = vmul.u32.u64.low %v750_v12, %v749_v54  ;;  %v3601_v9 = vmul.u32.u64.high %v750_v12, %v749_v54, %v3600_v20 }
 0x122   : > { %v3603_v38 = vsel %vm2430_vm2, 0, %v2429_v61  ;;  %v2400_v19 = vmin.u32 %v665_v8, %v3585_v40  ;;  %v718_v53 = vshrl.u32 %v4044_v26, %v3513_v47  ;;  %v745_v46 = vsel %vm735_vm3, %v742_v49, %v744_v10 }
 0x123   : > { %v987_v58 = vor.u32 4788187, %v986_v51  ;;  %v1170_v59 = vadd.s32 %v3190_v1, %v3198_v6  ;;  %v1191_v28 = vadd.s32 127, %v1190_v34  ;;  %vm2426_vm4 = vcmp.lt.s32.totalorder %v2425_v0, 0 }
 0x124   : > { %v1088_v48 = vadd.s32 127, %v1087_v27  ;;  %v667_v44 = vclz %v2400_v19  ;;  %v738_v61 = vsel %vm734_vm0, %v718_v53, %v721_v45  ;;  %v740_v54 = vsel %vm736_vm1, %v724_v15, %v739_v39 }
 0x125   : > { %v983_v26 = vor.u32 %v982_v29, %v981_v23  ;;  %v1396_v47 = vsub.s32 4294967266, %v3603_v38  ;;  %v3620_v51 = vmul.u32.u64.low %v750_v12, %v745_v46  ;;  %v3621_v49 = vmul.u32.u64.high %v750_v12, %v745_v46, %v3620_v51 }
 0x126   : > { %v1188_v1 = vshrl.u32 %v1170_v59, %v1186_v7  ;;  %v1083_v6 = vsub.s32 32, %v3581_v16  ;;  %v3625_v34 = vsel %vm2426_vm4, 0, %v2425_v0  ;;  %v2401_v10 = vadd.s32 4294967294, %v667_v44 }
 0x127   : > { %v988_v45 = vand.u32 2147483647, %v987_v58  ;;  %v1192_v27 = vshll.u32 %v1191_v28, 23  ;;  %v1067_v15 = vadd.s32 %v3262_v24, %v3277_v62  ;;  %v741_v32 = vsel %vm735_vm3, %v738_v61, %v740_v54 }
 0x128   : > { %v1187_v30 = vshll.u32 %v3385_v63, %v3562_v37  ;;  %v1089_v23 = vshll.u32 %v1088_v48, 23  ;;  %vm2402_vm5 = vcmp.lt.s32.totalorder %v2401_v10, 0  ;;  %vm759_vm6 = vc.u32 %v3601_v9, %v3620_v51 }
 0x129   : > { %v1397_v29 = vadd.s32 127, %v1396_v47  ;;  %v1293_v0 = vsub.s32 4294967266, %v3625_v34  ;;  %v670_v8 = vsel %vm2402_vm5, 0, %v2401_v10  ;;  %v760_v7 = vadd.s32 1, %v3621_v49 }
 0x12a   : > { %vm807_vm7 = vcmp.lt.s32.totalorder %v2975_v13, 0  ;;  %v1189_v24 = vor.u32 %v1188_v1, %v1187_v30  ;;  %v1085_v62 = vshrl.u32 %v1067_v15, %v1083_v6  ;;  %v675_v56 = vsub.s32 4294967266, %v670_v8 }
 0x12b   : > { %v757_v39 = vmul.u32 %v750_v12, %v741_v32  ;;  %v1193_v20 = vor.u32 4788187, %v1192_v27  ;;  %v1084_v63 = vshll.u32 %v3429_v52, %v3581_v16  ;;  %v1392_v37 = vsub.s32 32, %v3603_v38 }
 0x12c   : > { %v761_v19 = vsel %vm759_vm6, %v760_v7, %v3621_v49  ;;  %v1090_v53 = vor.u32 4788187, %v1089_v23  ;;  %v671_v46 = vsub.s32 32, %v670_v8  ;;  %v676_v58 = vadd.s32 127, %v675_v56 }
 0x12d   : > { %v762_v59 = vadd.s32 %v761_v19, %v757_v39  ;;  %v990_v28 = vcvt.s32.f32 %v983_v26  ;;  %v1376_v48 = vadd.s32 %v3350_v31, %v3359_v42  ;;  %v1398_v44 = vshll.u32 %v1397_v29, 23 }
 0x12e   : > { %v1294_v61 = vadd.s32 127, %v1293_v0  ;;  %v1086_v54 = vor.u32 %v1085_v62, %v1084_v63  ;;  %v655_v12 = vadd.s32 %v3505_v55, %v3503_v35  ;;  %v677_v47 = vshll.u32 %v676_v58, 23 }
 0x12f   : > { %v763_v52 = vadd.s32 536870912, %v762_v59  ;;  %vm910_vm8 = vcmp.lt.s32.totalorder %v2980_v18, 0  ;;  %v991_v16 = vmul.f32 %v990_v28, %v988_v45  ;;  %v1196_v49 = vcvt.s32.f32 %v1189_v24 }
 0x130   : > { %v1394_v1 = vshrl.u32 %v1376_v48, %v1392_v37  ;;  %v1289_v6 = vsub.s32 32, %v3625_v34  ;;  %v1194_v10 = vand.u32 2147483647, %v1193_v20  ;;  %v1091_v26 = vand.u32 2147483647, %v1090_v53 }
 0x131   : > { %v673_v27 = vshrl.u32 %v655_v12, %v671_v46  ;;  %v3648_v15 = vshrl.u32 %v763_v52, 30  ;;  %v1393_v31 = vshll.u32 %v3475_v3, %v3603_v38  ;;  %v1399_v42 = vor.u32 4788187, %v1398_v44 }
 0x132   : > { %v1273_v35 = vadd.s32 %v3456_v50, %v3454_v41  ;;  %v1295_v55 = vshll.u32 %v1294_v61, 23  ;;  %v1093_v32 = vcvt.s32.f32 %v1086_v54  ;;  %v672_v45 = vshll.u32 %v3585_v40, %v670_v8 }
 0x133   : > { %v678_v30 = vor.u32 4788187, %v677_v47  ;;  %v765_v23 = vshll.u32 %v3648_v15, 30  ;;  %v890_v29 = vsel %vm807_vm7, %v889_v5, %v3521_v36  ;;  %v992_v0 = vxor.u32 2147483648, %v991_v16 }
 0x134   : > { %v1395_v7 = vor.u32 %v1394_v1, %v1393_v31  ;;  %v1291_v3 = vshrl.u32 %v1273_v35, %v1289_v6  ;;  %v1197_v38 = vmul.f32 %v1196_v49, %v1194_v10  ;;  %v1094_v24 = vmul.f32 %v1093_v32, %v1091_v26 }
 0x135   : > { %v674_v62 = vor.u32 %v673_v27, %v672_v45  ;;  %v3661_v50 = vsub.s32 %v762_v59, %v765_v23  ;;  %v1400_v41 = vand.u32 2147483647, %v1399_v42  ;;  %v1290_v40 = vshll.u32 %v3532_v11, %v3625_v34 }
 0x136   : > { %v1296_v8 = vor.u32 4788187, %v1295_v55  ;;  %vm601_vm9 = vcmp.lt.s32.totalorder %v3092_v22, 0  ;;  %v4049_v56 = vand.u32 2147483647, %v2975_v13  ;;  %vm1116_vm11 = vcmp.lt.s32.totalorder %v3024_v25, 0 }
 0x137   : > { %v679_v36 = vand.u32 2147483647, %v678_v30  ;;  %v768_v5 = vsub.s32 0, %v3661_v50  ;;  %vm1013_vm12 = vcmp.lt.s32.totalorder %v3104_v33, 0  ;;  %v1402_v11 = vcvt.s32.f32 %v1395_v7 }
 0x138   : > { %vm3668_vm10 = vcmp.le.f32.partialorder %v4049_v56, 0.7853982  ;;  %v1292_v34 = vor.u32 %v1291_v3, %v1290_v40  ;;  %v891_v63 = vsub.s32 4, %v3074_v2  ;;  %v993_v37 = vsel %vm910_vm8, %v992_v0, %v991_v16 }
 0x139   : > { %v893_v20 = vsel %vm3668_vm10, %v2975_v13, %v890_v29  ;;  %v1198_v19 = vxor.u32 2147483648, %v1197_v38  ;;  %v681_v53 = vcvt.s32.f32 %v674_v62  ;;  %v2404_v46 = vmin.u32 %v768_v5, %v3661_v50 }
 0x13a   : > { %v1095_v58 = vxor.u32 2147483648, %v1094_v24  ;;  %v1403_v59 = vmul.f32 %v1402_v11, %v1400_v41  ;;  %v1297_v28 = vand.u32 2147483647, %v1296_v8  ;;  %2790 = vcosq.f32 %v893_v20 }
 0x13b   : > { %v4052_v48 = vand.u32 2147483647, %v3092_v22  ;;  %v682_v61 = vmul.f32 %v681_v53, %v679_v36  ;;  %v685_v54 = vsub.s32 4, %v3566_v21  ;;  %v770_v12 = vclz %v2404_v46 }
 0x13c   : > { %2792 = vsinq.f32 %v893_v20  ;;  %vm1322_vm14 = vcmp.lt.s32.totalorder %v3163_v43, 0  ;;  %v1299_v47 = vcvt.s32.f32 %v1292_v34  ;;  %v892_v52 = vsel %vm807_vm7, %v891_v63, %v3074_v2 }
 0x13d   : > { %vm3684_vm13 = vcmp.le.f32.partialorder %v4052_v48, 0.7853982  ;;  %v4055_v16 = vand.u32 2147483647, %v2980_v18  ;;  %v1199_v1 = vsel %vm1116_vm11, %v1198_v19, %v1197_v38  ;;  %vm1219_vm0 = vcmp.lt.s32.totalorder %v3269_v57, 0 }
 0x13e   : > { %v2405_v6 = vadd.s32 4294967294, %v770_v12  ;;  %v1096_v26 = vsel %vm1013_vm12, %v1095_v58, %v1094_v24  ;;  %v1404_v2 = vxor.u32 2147483648, %v1403_v59  ;;  %v1300_v27 = vmul.f32 %v1299_v47, %v1297_v28  ;;  %v4064_v58 = vld [vmem:[#allocation2_spill] sm:$0xff] }
 0x13f   : > { %vm3695_vm15 = vcmp.le.f32.partialorder %v4055_v16, 0.7853982  ;;  %v994_v31 = vsub.s32 4, %v3182_v60  ;;  %v683_v42 = vxor.u32 2147483648, %v682_v61  ;;  %v686_v35 = vsel %vm601_vm9, %v685_v54, %v3566_v21 }
 0x140   : > { %v996_v10 = vsel %vm3695_vm15, %v2980_v18, %v993_v37  ;;  %vm2406_vm1 = vcmp.lt.s32.totalorder %v2405_v6, 0  ;;  %v894_v55 = vsel %vm3668_vm10, 0, %v892_v52  ;;  %v758_v32 = vadd.s32 %v3620_v51, %v3601_v9 }
 0x141   : > { %v773_v45 = vsel %vm2406_vm1, 0, %v2405_v6  ;;  %2794 = vcosq.f32 %v996_v10  ;;  %v4058_v30 = vand.u32 2147483647, %v3104_v33  ;;  %v4061_v7 = vand.u32 2147483647, %v3024_v25 }
 0x142   : > { %v774_v29 = vsub.s32 32, %v773_v45  ;;  %v778_v0 = vsub.s32 4294967266, %v773_v45  ;;  %v1301_v9 = vxor.u32 2147483648, %v1300_v27  ;;  %v995_v51 = vsel %vm910_vm8, %v994_v31, %v3182_v60 }
 0x143   : > { %vm3717_vm2 = vcmp.le.f32.partialorder %v4058_v30, 0.7853982  ;;  %vm3726_vm3 = vcmp.le.f32.partialorder %v4061_v7, 0.7853982  ;;  %2796 = vsinq.f32 %v996_v10  ;;  %v684_v24 = vsel %vm601_vm9, %v683_v42, %v682_v61 }
 0x144   : > { %v1099_v21 = vsel %vm3717_vm2, %v3104_v33, %v1096_v26  ;;  %v1202_v38 = vsel %vm3726_vm3, %v3024_v25, %v1199_v1  ;;  %v775_v62 = vshll.u32 %v3661_v50, %v773_v45  ;;  %v776_v41 = vshrl.u32 %v758_v32, %v774_v29  ;;  %v2791_v8 = vpop.eup %2790 }
 0x145   : > { %v779_v40 = vadd.s32 127, %v778_v0  ;;  %v1405_v56 = vsel %vm1322_vm14, %v1404_v2, %v1403_v59  ;;  %v688_v39 = vsel %vm3684_vm13, 0, %v686_v35  ;;  %vm704_vm4 = vcmp.lt.s32.totalorder %v3122_v17, 0 }
 0x146   : > { %2798 = vcosq.f32 %v1099_v21  ;;  %v2793_v60 = vpop.eup %2792  ;;  %v777_v36 = vor.u32 %v776_v41, %v775_v62  ;;  %v898_v20 = vand.u32 3, %v894_v55  ;;  %v1302_v50 = vsel %vm1219_vm0, %v1301_v9, %v1300_v27  ;;  %v4074_v62 = vld [vmem:[#allocation3_spill] sm:$0xff] }
 0x147   : > { %v780_v5 = vshll.u32 %v779_v40, 23  ;;  %2800 = vsinq.f32 %v1099_v21  ;;  %v687_v11 = vsel %vm3684_vm13, %v3092_v22, %v684_v24  ;;  %v997_v34 = vsel %vm3695_vm15, 0, %v995_v51 }
 0x148   : > { %2802 = vcosq.f32 %v1202_v38  ;;  %v904_v37 = vxor.u32 2147483648, %v2791_v8  ;;  %v1097_v19 = vsub.s32 4, %v3389_v4  ;;  %v788_v53 = vsub.s32 4, %v3648_v15 }
 0x149   : > { %v781_v63 = vor.u32 4788187, %v780_v5  ;;  %2804 = vsinq.f32 %v1202_v38  ;;  %v901_v46 = vxor.u32 2147483648, %v2793_v60  ;;  %v1200_v59 = vsub.s32 4, %v4064_v58 }
 0x14a   : > { %v4065_v28 = vand.u32 2147483647, %v3269_v57  ;;  %2806 = vcosq.f32 %v687_v11  ;;  %v784_v61 = vcvt.s32.f32 %v777_v36  ;;  %v3765_v47 = vand.u32 3, %v688_v39 }
 0x14b   : > { %v782_v44 = vand.u32 2147483647, %v781_v63  ;;  %v3763_v12 = vpop.eup %2794  ;;  %2808 = vsinq.f32 %v687_v11  ;;  %vm900_vm6 = vcmp.eq.s32.totalorder %v898_v20, 0  ;;  %v4068_v52 = vand.u32 2147483647, %v3163_v43 }
 0x14c   : > { %vm3756_vm5 = vcmp.le.f32.partialorder %v4065_v28, 0.7853982  ;;  %vm903_vm8 = vcmp.eq.s32.totalorder %v898_v20, 2  ;;  %v1098_v1 = vsel %vm1013_vm12, %v1097_v19, %v3389_v4  ;;  %v902_v26 = vsel %vm900_vm6, %v2791_v8, %v901_v46 }
 0x14d   : > { %v1305_v54 = vsel %vm3756_vm5, %v3269_v57, %v1302_v50  ;;  %vm3769_vm7 = vcmp.le.f32.partialorder %v4068_v52, 0.7853982  ;;  %v785_v49 = vmul.f32 %v784_v61, %v782_v44  ;;  %v2797_v10 = vpop.eup %2796  ;;  %v905_v2 = vsel %vm903_vm8, %v904_v37, %v2793_v60 }
 0x14e   : > { %v1408_v6 = vsel %vm3769_vm7, %v3163_v43, %v1405_v56  ;;  %v3779_v27 = vand.u32 3, %v997_v34  ;;  %2810 = vcosq.f32 %v1305_v54  ;;  %v789_v42 = vsel %vm704_vm4, %v788_v53, %v3648_v15 }
 0x14f   : > { %v786_v31 = vxor.u32 2147483648, %v785_v49  ;;  %v1201_v35 = vsel %vm1116_vm11, %v1200_v59, %v4064_v58  ;;  %2812 = vsinq.f32 %v1305_v54  ;;  %v4071_v55 = vand.u32 2147483647, %v3122_v17 }
 0x150   : > { %v2799_v4 = vpop.eup %2798  ;;  %vm897_vm10 = vweird.f32 %v2975_v13  ;;  %v1100_v45 = vsel %vm3717_vm2, 0, %v1098_v1  ;;  %2814 = vcosq.f32 %v1408_v6  ;;  %vm899_vm12 = vcmp.lt.s32.totalorder %v898_v20, 2 }
 0x151   : > { %vm3789_vm9 = vcmp.le.f32.partialorder %v4071_v55, 0.7853982  ;;  %v2801_v30 = vpop.eup %2800  ;;  %v787_v15 = vsel %vm704_vm4, %v786_v31, %v785_v49  ;;  %v1303_v29 = vsub.s32 4, %v3496_v14  ;;  %2816 = vsinq.f32 %v1408_v6 }
 0x152   : > { %v2803_v0 = vpop.eup %2802  ;;  %v790_v21 = vsel %vm3789_vm9, %v3122_v17, %v787_v15  ;;  %v791_v7 = vsel %vm3789_vm9, 0, %v789_v42  ;;  %v906_v9 = vsel %vm899_vm12, %v902_v26, %v905_v2  ;;  %v1203_v23 = vsel %vm3726_vm3, 0, %v1201_v35 }
 0x153   : > { %v2805_v51 = vpop.eup %2804  ;;  %vm697_vm11 = vcmp.eq.s32.totalorder %v3765_v47, 2  ;;  %2818 = vcosq.f32 %v790_v21  ;;  %vm1002_vm13 = vcmp.lt.s32.totalorder %v3779_v27, 2  ;;  %v1004_v38 = vxor.u32 2147483648, %v2797_v10 }
 0x154   : > { %v1104_v24 = vand.u32 3, %v1100_v45  ;;  %v1406_v41 = vsub.s32 4, %v4074_v62  ;;  %vm694_vm15 = vcmp.eq.s32.totalorder %v3765_v47, 0  ;;  %2820 = vsinq.f32 %v790_v21  ;;  %v2807_v3 = vpop.eup %2806 }
 0x155   : > { %vm1003_vm1 = vcmp.eq.s32.totalorder %v3779_v27, 0  ;;  %v1007_v40 = vxor.u32 2147483648, %v3763_v12  ;;  %v1110_v8 = vxor.u32 2147483648, %v2799_v4  ;;  %vm1006_vm2 = vcmp.eq.s32.totalorder %v3779_v27, 2  ;;  %v2809_v36 = vpop.eup %2808 }
 0x156   : > { %v1107_v56 = vxor.u32 2147483648, %v2801_v30  ;;  %v1207_v39 = vand.u32 3, %v1203_v23  ;;  %v1304_v60 = vsel %vm1219_vm0, %v1303_v29, %v3496_v14  ;;  %v795_v5 = vand.u32 3, %v791_v7 }
 0x157   : > { %v3818_v20 = vsel %vm897_vm10, nan, %v906_v9  ;;  %vm1000_vm3 = vweird.f32 %v2980_v18  ;;  %vm1103_vm4 = vweird.f32 %v3104_v33  ;;  %v1210_v50 = vxor.u32 2147483648, %v2805_v51 }
 0x158   : > { %v1213_v11 = vxor.u32 2147483648, %v2803_v0  ;;  %vm693_vm6 = vcmp.lt.s32.totalorder %v3765_v47, 2  ;;  %v1005_v34 = vsel %vm1003_vm1, %v3763_v12, %v1004_v38  ;;  %vm1106_vm8 = vcmp.eq.s32.totalorder %v1104_v24, 0  ;;  %v2811_v14 = vpop.eup %2810 }
 0x159   : > { %vm1109_vm0 = vcmp.eq.s32.totalorder %v1104_v24, 2  ;;  %v1407_v13 = vsel %vm1322_vm14, %v1406_v41, %v4074_v62  ;;  %v698_v63 = vxor.u32 2147483648, %v2807_v3  ;;  %v1008_v37 = vsel %vm1006_vm2, %v1007_v40, %v2797_v10  ;;  %v2813_v46 = vpop.eup %2812  ;;  %v2757_v40 = vld [vmem:[%s4006_s7 + $0x8] ss:$0 sps:$4 sm:$0x33]  }
 0x15a   : > { %v1111_v19 = vsel %vm1109_vm0, %v1110_v8, %v2801_v30  ;;  %v1306_v53 = vsel %vm3756_vm5, 0, %v1304_v60  ;;  %v695_v58 = vxor.u32 2147483648, %v2809_v36  ;;  %v1108_v59 = vsel %vm1106_vm8, %v2799_v4, %v1107_v56  ;;  %v2815_v28 = vpop.eup %2814  ;;  %v1641_v56 = vld [vmem:[%s512_s25 + $0x10] sm:$0xff]  ;;  %v1642_v60 = vld [vmem:[%s512_s25 + $0x18] sm:$0xff] }
 0x15b   : > { %vm1209_vm10 = vcmp.eq.s32.totalorder %v1207_v39, 0  ;;  %vm1212_vm12 = vcmp.eq.s32.totalorder %v1207_v39, 2  ;;  %vm691_vm1 = vweird.f32 %v3092_v22  ;;  %vm794_vm9 = vweird.f32 %v3122_v17  ;;  %v2817_v12 = vpop.eup %2816 }
 0x15c   : > { %vm796_vm14 = vcmp.lt.s32.totalorder %v795_v5, 2  ;;  %v1211_v44 = vsel %vm1209_vm10, %v2803_v0, %v1210_v50  ;;  %v1214_v61 = vsel %vm1212_vm12, %v1213_v11, %v2805_v51  ;;  %v1409_v54 = vsel %vm3769_vm7, 0, %v1407_v13  ;;  %v1643_v50 = vld [vmem:[%s512_s25 + $0x20] sm:$0xff]  ;;  %v1644_v11 = vld [vmem:[%s512_s25 + $0x28] sm:$0xff]  ;;  %v1645_v13 = vld [vmem:[%s512_s25 + $0x30] sm:$0xff] }
 0x15d   : > { %vm797_vm2 = vcmp.eq.s32.totalorder %v795_v5, 0  ;;  %vm800_vm0 = vcmp.eq.s32.totalorder %v795_v5, 2  ;;  %vm1105_vm5 = vcmp.lt.s32.totalorder %v1104_v24, 2  ;;  %v1310_v48 = vand.u32 3, %v1306_v53  ;;  %v2819_v6 = vpop.eup %2818  ;;  %v2759_v5 = vld [vmem:[%s4005_s6 + $0x8] sm:$0xff]  }
 0x15e   : > { %v699_v52 = vsel %vm697_vm11, %v698_v63, %v2809_v36  ;;  %v1009_v49 = vsel %vm1002_vm13, %v1005_v34, %v1008_v37  ;;  %v1112_v1 = vsel %vm1105_vm5, %v1108_v59, %v1111_v19  ;;  %vm1208_vm8 = vcmp.lt.s32.totalorder %v1207_v39, 2  ;;  %v2821_v31 = vpop.eup %2820  ;;  %v2761_v37 = vld [vmem:[%s4005_s6 + $0x18] sm:$0xff]   ;;  %v2766_v19 = vld [vmem:[%s4008_s9] sm:$0xff]   ;;  %v2767_v53 = vld [vmem:[%s4008_s9 + $0x8] sm:$0xff]  }
 0x15f   : > { %v696_v10 = vsel %vm694_vm15, %v2807_v3, %v695_v58  ;;  %v1215_v26 = vsel %vm1208_vm8, %v1211_v44, %v1214_v61  ;;  %v1316_v16 = vxor.u32 2147483648, %v2811_v14  ;;  %v1413_v2 = vand.u32 3, %v1409_v54  ;;  %v1640_v3 = vld [vmem:[%s512_s25 + $0x8] sm:$0xff]  ;;  %2618 = vmatprep.subr.bf16.mxu0 %v2766_v19  ;;  %v2768_v58 = vld [vmem:[%s4008_s9 + $0x10] sm:$0xff]   ;;  %v2770_v61 = vld [vmem:[%s4008_s9 + $0x20] sm:$0xff]  }
 0x160   : > { %v801_v42 = vxor.u32 2147483648, %v2819_v6  ;;  %v1313_v35 = vxor.u32 2147483648, %v2813_v46  ;;  %v1416_v4 = vxor.u32 2147483648, %v2817_v12  ;;  %v1419_v55 = vxor.u32 2147483648, %v2815_v28  ;;  %v2763_v59 = vld [vmem:[%s4005_s6 + $0x28] sm:$0xff]   ;;  %v2764_v44 = vld [vmem:[%s4005_s6 + $0x30] sm:$0xff]  }
 0x161   : > { %v798_v32 = vxor.u32 2147483648, %v2821_v31  ;;  %v1010_v45 = vsel %vm1000_vm3, nan, %v1009_v49  ;;  %v1113_v27 = vsel %vm1103_vm4, nan, %v1112_v1  ;;  %vm1312_vm7 = vcmp.eq.s32.totalorder %v1310_v48, 0  ;;  %v2765_v54 = vld [vmem:[%s4005_s6 + $0x38] sm:$0xff]  }
 0x162   : > { %v700_v30 = vsel %vm693_vm6, %v696_v10, %v699_v52  ;;  %v802_v15 = vsel %vm800_vm0, %v801_v42, %v2821_v31  ;;  %vm4075_vm11 = vweird.f32 %v3024_v25  ;;  %vm1315_vm13 = vcmp.eq.s32.totalorder %v1310_v48, 2 }
 0x163   : > { %v1216_v29 = vsel %vm4075_vm11, nan, %v1215_v26  ;;  %v799_v0 = vsel %vm797_vm2, %v2819_v6, %v798_v32  ;;  %v1317_v21 = vsel %vm1315_vm13, %v1316_v16, %v2813_v46  ;;  %vm1415_vm15 = vcmp.eq.s32.totalorder %v1413_v2, 0  ;;  %v2762_v46 = vld [vmem:[%s4005_s6 + $0x20] sm:$0xff]  }
 0x164   : > { %vm1418_vm10 = vcmp.eq.s32.totalorder %v1413_v2, 2  ;;  %v803_v18 = vsel %vm796_vm14, %v799_v0, %v802_v15  ;;  %v1314_v7 = vsel %vm1312_vm7, %v2811_v14, %v1313_v35  ;;  %v1417_v33 = vsel %vm1415_vm15, %v2815_v28, %v1416_v4  ;;  %v1646_v14 = vld [vmem:[%s512_s25 + $0x38] sm:$0xff] }
 0x165   : > { %v1420_v9 = vsel %vm1418_vm10, %v1419_v55, %v2817_v12  ;;  %v701_v47 = vsel %vm691_vm1, nan, %v700_v30  ;;  %v804_v23 = vsel %vm794_vm9, nan, %v803_v18  ;;  %v1424_v25 = vpack.c.bf16 %v1010_v45, %v3818_v20  ;;  %v2760_v20 = vld [vmem:[%s4005_s6 + $0x10] sm:$0xff]   ;;  %v2769_v28 = vld [vmem:[%s4008_s9 + $0x18] sm:$0xff]   ;;  %v2771_v12 = vld [vmem:[%s4008_s9 + $0x28] sm:$0xff]  }
 0x166   : > { %v1423_v51 = vpack.c.bf16 %v804_v23, %v701_v47  ;;  %v1425_v38 = vpack.c.bf16 %v1216_v29, %v1113_v27  ;;  %vm1311_vm3 = vcmp.lt.s32.totalorder %v1310_v48, 2  ;;  %vm1414_vm4 = vcmp.lt.s32.totalorder %v1413_v2, 2  ;;  %v2431_v48 = vld [vmem:[%s4004_s5] ss:$0 sm:$0xff] }
 0x167   : > { %v1318_v24 = vsel %vm1311_vm3, %v1314_v7, %v1317_v21  ;;  %v1421_v62 = vsel %vm1414_vm4, %v1417_v33, %v1420_v9  ;;  %vm1309_vm6 = vweird.f32 %v3269_v57  ;;  %vm1412_vm12 = vweird.f32 %v3163_v43  ;;  %v2758_v43 = vld [vmem:[%s4005_s6] sm:$0xff]  }
 0x168   : > { %2574 = vmatprep.mubr.bf16.mxu0 %v1423_v51  ;;  %v1319_v22 = vsel %vm1309_vm6, nan, %v1318_v24  ;;  %v1422_v41 = vsel %vm1412_vm12, nan, %v1421_v62  ;;  %vm1676_vm9 = vcmask 1041408   ;;  %v1639_v57 = vld [vmem:[%s512_s25] sm:$0xff]  ;;  %vm1663_vm1 = vcmask 162816  }
 0x169   : > { %2575 = vmatmul.mubr.bf16.vlgmr.msra.gmra.mrb[0].mxu0 %v1424_v25  ;;  %v1426_v17 = vpack.c.bf16 %v1422_v41, %v1319_v22  ;;  %2698 = vmatprep.subr.msk.bf16.mxu1 %vm1676_vm9, %v2757_v40  ;;  %v1678_v8 = vsel %vm1676_vm9, %v2757_v40, 0  ;;  %v1647_v39 = vpack.c.bf16 %v1640_v3, %v1639_v57  ;;  %v1648_v36 = vpack.c.bf16 %v1642_v60, %v1641_v56 }
 0x16a   : > { %2578 = vmatprep.mubr.bf16.mxu0 %v1425_v38  ;;  %2585 = vmatpush3.bf16.msra.mxu1 %v1678_v8  ;;  %v1649_v34 = vpack.c.bf16 %v1644_v11, %v1643_v50  ;;  %v1650_v63 = vpack.c.bf16 %v1646_v14, %v1645_v13  ;;  %vm2309_vm14 = vcmask 130048  }
 0x16b   : > { %2594 = vmatprep.subr.bf16.mxu1 %v2758_v43  ;;  %2586 = vmatprep.mubr.msk.bf16.mxu1 %vm1663_vm1, %v1647_v39 }
 0x16c   : > { %2619 = vmatpush3.bf16.msra.mxu0 %v2766_v19 }
 0x16d   : > { %2587 = vmatmul.mubr.msk.bf16.vlgmr.msra.gmra.mrb[0].mxu1 %vm1663_vm1, %v1648_v36  ;;  %2620 = vmatprep.subr.bf16.mxu0 %v2767_v53 }
 0x16e   : > { %2595 = vmatpush3.bf16.msra.mxu1 %v2758_v43  ;;  %2590 = vmatprep.mubr.msk.bf16.mxu1 %vm1663_vm1, %v1649_v34 }
 0x16f   : > { %2596 = vmatprep.subr.bf16.mxu1 %v2759_v5 }
 0x170   : > { %2621 = vmatpush3.bf16.msra.mxu0 %v2767_v53 }
 0x171   : > { %2579 = vmatmul.mubr.bf16.gmra.mrb[4].mxu0 %v1426_v17  ;;  %2622 = vmatprep.subr.bf16.mxu0 %v2768_v58 }
 0x172   : > { %2597 = vmatpush3.bf16.msra.mxu1 %v2759_v5 }
 0x173   : > { %2598 = vmatprep.subr.bf16.mxu1 %v2760_v20 }
 0x174   : > { %2623 = vmatpush3.bf16.msra.mxu0 %v2768_v58 }
 0x175   : > { %2591 = vmatmul.mubr.msk.bf16.gmra.mrb[4].mxu1 %vm1663_vm1, %v1650_v63  ;;  %2624 = vmatprep.subr.bf16.mxu0 %v2769_v28 }
 0x176   : > { %2599 = vmatpush3.bf16.msra.mxu1 %v2760_v20 }
 0x177   : > { %2600 = vmatprep.subr.bf16.mxu1 %v2761_v37 }
 0x178   : > { %2625 = vmatpush3.bf16.msra.mxu0 %v2769_v28 }
 0x179   : > { %2626 = vmatprep.subr.bf16.mxu0 %v2770_v61 }
 0x17a   : > { %2601 = vmatpush3.bf16.msra.mxu1 %v2761_v37 }
 0x17b   : > { %2602 = vmatprep.subr.bf16.mxu1 %v2762_v46 }
 0x17c   : > { %2627 = vmatpush3.bf16.msra.mxu0 %v2770_v61  ;;  %v2772_v61 = vld [vmem:[%s4008_s9 + $0x30] sm:$0xff]  }
 0x17d   : > { %2628 = vmatprep.subr.bf16.mxu0 %v2771_v12 }
 0x17e   : > { %2603 = vmatpush3.bf16.msra.mxu1 %v2762_v46 }
 0x17f   : > { %2604 = vmatprep.subr.bf16.mxu1 %v2763_v59 }
 0x180   : > { %2629 = vmatpush3.bf16.msra.mxu0 %v2771_v12  ;;  %v2774_v12 = vld [vmem:[%s4010_s11] sm:$0xff]  }
 0x181   : > { %2630 = vmatprep.subr.bf16.mxu0 %v2772_v61 }
 0x182   : > { %2605 = vmatpush3.bf16.msra.mxu1 %v2763_v59 }
 0x183   : > { %2606 = vmatprep.subr.bf16.mxu1 %v2764_v44 }
 0x184   : > { %2631 = vmatpush3.bf16.msra.mxu0 %v2772_v61 }
 0x186   : > { %2607 = vmatpush3.bf16.msra.mxu1 %v2764_v44 }
 0x187   : > { %2608 = vmatprep.subr.bf16.mxu1 %v2765_v54 }
 0x18a   : > { %2609 = vmatpush3.bf16.msra.mxu1 %v2765_v54  ;;  %v2773_v54 = vld [vmem:[%s4008_s9 + $0x38] sm:$0xff]  }
 0x18b   : > { %2632 = vmatprep.subr.bf16.mxu0 %v2773_v54  ;;  %2642 = vmatprep.subr.bf16.mxu1 %v2774_v12 }
 0x18c   : > { %2633 = vmatpush3.bf16.msra.mxu0 %v2773_v54 }
 0x23c   : > { %v2576_v52 = vpop.f32.mrb[0].mxu0 }
 0x23d   : > { %v1541_v49 = vadd.f32 %v2576_v52, %v2431_v48  ;;  %v1532_v1 = vpop.f32.mrb[1].mxu0  ;;  %v2776_v52 = vld [vmem:[%s4010_s11 + $0x10] sm:$0xff]  }
 0x23e   : > { %v1533_v6 = vadd.f32 %v2431_v48, %v1532_v1  ;;  %v2577_v10 = vpop.f32.mrb[2].mxu0  ;;  %v2778_v1 = vld [vmem:[%s4010_s11 + $0x20] sm:$0xff]  }
 0x23f   : > { %v2442_v26 = vmul.f32 -1.442695, %v1541_v49  ;;  %v1544_v16 = vadd.f32 %v2577_v10, %v2431_v48  ;;  %v1535_v2 = vpop.f32.mrb[3].mxu0 }
 0x240   : > { %v2440_v31 = vmul.f32 -1.442695, %v1533_v6  ;;  %v1536_v42 = vadd.f32 %v2431_v48, %v1535_v2 }
 0x241   : > { %2822 = vpow2.f32 %v2442_v26  ;;  %v2443_v35 = vmul.f32 -1.442695, %v1544_v16  ;;  %v2462_v26 = vld [vmem:[%s4007_s8] ss:$0 sm:$0xff] }
 0x242   : > { %2824 = vpow2.f32 %v2440_v31  ;;  %v2441_v4 = vmul.f32 -1.442695, %v1536_v42 }
 0x243   : > { %2826 = vpow2.f32 %v2443_v35 }
 0x244   : > { %2828 = vpow2.f32 %v2441_v4  ;;  %v2580_v55 = vpop.f32.mrb[4].mxu0 }
 0x245   : > { %v1557_v32 = vadd.f32 %v2580_v55, %v2431_v48  ;;  %v1548_v45 = vpop.f32.mrb[5].mxu0 }
 0x246   : > { %v1549_v27 = vadd.f32 %v2431_v48, %v1548_v45  ;;  %v2581_v30 = vpop.f32.mrb[6].mxu0 }
 0x247   : > { %v2446_v15 = vmul.f32 -1.442695, %v1557_v32  ;;  %v1560_v29 = vadd.f32 %v2581_v30, %v2431_v48  ;;  %v1551_v0 = vpop.f32.mrb[7].mxu0 }
 0x248   : > { %v2444_v21 = vmul.f32 -1.442695, %v1549_v27  ;;  %v1552_v18 = vadd.f32 %v2431_v48, %v1551_v0  ;;  %v2775_v48 = vld [vmem:[%s4010_s11 + $0x8] sm:$0xff]  }
 0x249   : > { %2830 = vpow2.f32 %v2446_v15  ;;  %v2447_v7 = vmul.f32 -1.442695, %v1560_v29 }
 0x24a   : > { %2832 = vpow2.f32 %v2444_v21  ;;  %v2445_v33 = vmul.f32 -1.442695, %v1552_v18 }
 0x24b   : > { %v2823_v9 = vpop.eup %2822  ;;  %2834 = vpow2.f32 %v2447_v7 }
 0x24c   : > { %v2825_v47 = vpop.eup %2824  ;;  %v1589_v23 = vadd.f32 1.0, %v2823_v9  ;;  %2836 = vpow2.f32 %v2445_v33 }
 0x24d   : > { %v2827_v25 = vpop.eup %2826  ;;  %v1587_v51 = vadd.f32 1.0, %v2825_v47  ;;  %v2780_v47 = vld [vmem:[%s4010_s11 + $0x30] sm:$0xff]  }
 0x24e   : > { %v2829_v38 = vpop.eup %2828  ;;  %2838 = vrcp.f32 %v1589_v23  ;;  %v1590_v24 = vadd.f32 1.0, %v2827_v25  ;;  %v2781_v23 = vld [vmem:[%s4010_s11 + $0x38] sm:$0xff]   ;;  %v2782_v25 = vld [vmem:[%s4012_s13] sm:$0xff]  }
 0x24f   : > { %2840 = vrcp.f32 %v1587_v51  ;;  %v1588_v62 = vadd.f32 1.0, %v2829_v38  ;;  %v2783_v51 = vld [vmem:[%s4012_s13 + $0x8] sm:$0xff]   ;;  %2666 = vmatprep.subr.bf16.mxu0 %v2782_v25  ;;  %v2784_v38 = vld [vmem:[%s4012_s13 + $0x10] sm:$0xff]  }
 0x250   : > { %2842 = vrcp.f32 %v1590_v24  ;;  %v2785_v24 = vld [vmem:[%s4012_s13 + $0x18] sm:$0xff]  }
 0x251   : > { %2844 = vrcp.f32 %v1588_v62  ;;  %v2786_v62 = vld [vmem:[%s4012_s13 + $0x20] sm:$0xff]  }
 0x253   : > { %v2831_v22 = vpop.eup %2830 }
 0x254   : > { %v2833_v41 = vpop.eup %2832  ;;  %v1593_v17 = vadd.f32 1.0, %v2831_v22  ;;  %v2787_v22 = vld [vmem:[%s4012_s13 + $0x28] sm:$0xff]  }
 0x255   : > { %v2835_v40 = vpop.eup %2834  ;;  %v1591_v8 = vadd.f32 1.0, %v2833_v41  ;;  %v2463_v41 = vld [vmem:[%s4009_s10] ss:$0 sm:$0xff] }
 0x256   : > { %v2837_v43 = vpop.eup %2836  ;;  %2846 = vrcp.f32 %v1593_v17  ;;  %v1594_v57 = vadd.f32 1.0, %v2835_v40 }
 0x257   : > { %2848 = vrcp.f32 %v1591_v8  ;;  %v1592_v3 = vadd.f32 1.0, %v2837_v43 }
 0x258   : > { %v2839_v56 = vpop.eup %2838  ;;  %2850 = vrcp.f32 %v1594_v57 }
 0x259   : > { %v2841_v39 = vpop.eup %2840  ;;  %2852 = vrcp.f32 %v1592_v3  ;;  %v1613_v5 = vmul.f32 %v2839_v56, %v1541_v49  ;;  %v2777_v49 = vld [vmem:[%s4010_s11 + $0x18] sm:$0xff]  }
 0x25a   : > { %v2843_v60 = vpop.eup %2842  ;;  %v1611_v50 = vmul.f32 %v2841_v39, %v1533_v6  ;;  %v2779_v6 = vld [vmem:[%s4010_s11 + $0x28] sm:$0xff]  }
 0x25b   : > { %v2845_v36 = vpop.eup %2844  ;;  %v1614_v20 = vmul.f32 %v2843_v60, %v1544_v16 }
 0x25c   : > { %v1612_v11 = vmul.f32 %v2845_v36, %v1536_v42 }
 0x25d   : > { %v1620_v34 = vpack.c.bf16 %v1614_v20, %v1613_v5 }
 0x25e   : > { %v1619_v13 = vpack.c.bf16 %v1612_v11, %v1611_v50 }
 0x260   : > { %v2847_v14 = vpop.eup %2846  ;;  %2610 = vmatprep.mubr.bf16.mxu1 %v1619_v13 }
 0x261   : > { %v2849_v63 = vpop.eup %2848  ;;  %2611 = vmatmul.mubr.bf16.vlgmr.msra.gmra.mrb[0].mxu1 %v1620_v34  ;;  %v1617_v53 = vmul.f32 %v2847_v14, %v1557_v32 }
 0x262   : > { %v2851_v37 = vpop.eup %2850  ;;  %v1615_v58 = vmul.f32 %v2849_v63, %v1549_v27  ;;  %2643 = vmatpush3.bf16.msra.mxu1 %v2774_v12  ;;  %v2788_v12 = vld [vmem:[%s4012_s13 + $0x30] sm:$0xff]  }
 0x263   : > { %v2853_v19 = vpop.eup %2852  ;;  %v1618_v46 = vmul.f32 %v2851_v37, %v1560_v29  ;;  %2644 = vmatprep.subr.bf16.mxu1 %v2775_v48 }
 0x264   : > { %v1616_v59 = vmul.f32 %v2853_v19, %v1552_v18 }
 0x265   : > { %v1622_v28 = vpack.c.bf16 %v1618_v46, %v1617_v53 }
 0x266   : > { %v1621_v44 = vpack.c.bf16 %v1616_v59, %v1615_v58  ;;  %2645 = vmatpush3.bf16.msra.mxu1 %v2775_v48  ;;  %v2789_v48 = vld [vmem:[%s4012_s13 + $0x38] sm:$0xff]  }
 0x267   : > { %2646 = vmatprep.subr.bf16.mxu1 %v2776_v52 }
 0x268   : > { %2614 = vmatprep.mubr.bf16.mxu1 %v1621_v44 }
 0x269   : > { %2615 = vmatmul.mubr.bf16.gmra.mrb[4].mxu1 %v1622_v28 }
 0x26a   : > { %2647 = vmatpush3.bf16.msra.mxu1 %v2776_v52  ;;  %v2472_v52 = vld [vmem:[%s4011_s12] ss:$0 sm:$0xff] }
 0x26b   : > { %2648 = vmatprep.subr.bf16.mxu1 %v2777_v49 }
 0x26e   : > { %2649 = vmatpush3.bf16.msra.mxu1 %v2777_v49 }
 0x26f   : > { %2650 = vmatprep.subr.bf16.mxu1 %v2778_v1 }
 0x272   : > { %2651 = vmatpush3.bf16.msra.mxu1 %v2778_v1 }
 0x273   : > { %2652 = vmatprep.subr.bf16.mxu1 %v2779_v6 }
 0x276   : > { %2653 = vmatpush3.bf16.msra.mxu1 %v2779_v6 }
 0x277   : > { %2654 = vmatprep.subr.bf16.mxu1 %v2780_v47 }
 0x27a   : > { %2655 = vmatpush3.bf16.msra.mxu1 %v2780_v47 }
 0x27b   : > { %2656 = vmatprep.subr.bf16.mxu1 %v2781_v23 }
 0x27e   : > { %2657 = vmatpush3.bf16.msra.mxu1 %v2781_v23 }
 0x334   : > { %v2612_v10 = vpop.f32.mrb[0].mxu1 }
 0x335   : > { %v1827_v16 = vpop.f32.mrb[1].mxu1  ;;  %v1867_v31 = vadd.f32 %v2612_v10, %v2462_v26 }
 0x336   : > { %v2613_v2 = vpop.f32.mrb[2].mxu1  ;;  %v1865_v4 = vadd.f32 %v2462_v26, %v1827_v16 }
 0x337   : > { %v1868_v42 = vadd.f32 %v2613_v2, %v2462_v26  ;;  %v1830_v35 = vpop.f32.mrb[3].mxu1 }
 0x338   : > { %v1866_v55 = vadd.f32 %v2462_v26, %v1830_v35 }
 0x339   : > { %v1874_v32 = vpack.c.bf16 %v1868_v42, %v1867_v31 }
 0x33a   : > { %v1873_v45 = vpack.c.bf16 %v1866_v55, %v1865_v4 }
 0x33c   : > { %v2616_v27 = vpop.f32.mrb[4].mxu1  ;;  %2634 = vmatprep.mubr.bf16.mxu0 %v1873_v45 }
 0x33d   : > { %v1843_v30 = vpop.f32.mrb[5].mxu1  ;;  %2635 = vmatmul.mubr.bf16.vlgmr.msra.gmra.mrb[8].mxu0 %v1874_v32  ;;  %v1871_v29 = vadd.f32 %v2616_v27, %v2462_v26 }
 0x33e   : > { %v2617_v15 = vpop.f32.mrb[6].mxu1  ;;  %v1869_v18 = vadd.f32 %v2462_v26, %v1843_v30  ;;  %2667 = vmatpush3.bf16.msra.mxu0 %v2782_v25 }
 0x33f   : > { %v1872_v0 = vadd.f32 %v2617_v15, %v2462_v26  ;;  %v1846_v21 = vpop.f32.mrb[7].mxu1  ;;  %2668 = vmatprep.subr.bf16.mxu0 %v2783_v51 }
 0x340   : > { %v1870_v7 = vadd.f32 %v2462_v26, %v1846_v21 }
 0x341   : > { %v1876_v33 = vpack.c.bf16 %v1872_v0, %v1871_v29 }
 0x342   : > { %v1875_v9 = vpack.c.bf16 %v1870_v7, %v1869_v18  ;;  %2669 = vmatpush3.bf16.msra.mxu0 %v2783_v51 }
 0x343   : > { %2670 = vmatprep.subr.bf16.mxu0 %v2784_v38 }
 0x344   : > { %2638 = vmatprep.mubr.bf16.mxu0 %v1875_v9 }
 0x345   : > { %2639 = vmatmul.mubr.bf16.gmra.mrb[12].mxu0 %v1876_v33 }
 0x346   : > { %2671 = vmatpush3.bf16.msra.mxu0 %v2784_v38  ;;  %v2481_v38 = vld [vmem:[%s4013_s14] ss:$0 sm:$0xff] }
 0x347   : > { %2672 = vmatprep.subr.bf16.mxu0 %v2785_v24 }
 0x34a   : > { %2673 = vmatpush3.bf16.msra.mxu0 %v2785_v24 }
 0x34b   : > { %2674 = vmatprep.subr.bf16.mxu0 %v2786_v62 }
 0x34e   : > { %2675 = vmatpush3.bf16.msra.mxu0 %v2786_v62 }
 0x34f   : > { %2676 = vmatprep.subr.bf16.mxu0 %v2787_v22 }
 0x352   : > { %2677 = vmatpush3.bf16.msra.mxu0 %v2787_v22 }
 0x353   : > { %2678 = vmatprep.subr.bf16.mxu0 %v2788_v12 }
 0x356   : > { %2679 = vmatpush3.bf16.msra.mxu0 %v2788_v12 }
 0x357   : > { %2680 = vmatprep.subr.bf16.mxu0 %v2789_v48 }
 0x35a   : > { %2681 = vmatpush3.bf16.msra.mxu0 %v2789_v48 }
 0x410   : > { %v2636_v17 = vpop.f32.mrb[8].mxu0 }
 0x411   : > { %v1991_v40 = vadd.f32 %v2636_v17, %v2463_v41  ;;  %v1982_v8 = vpop.f32.mrb[9].mxu0 }
 0x412   : > { %v1983_v43 = vadd.f32 %v2463_v41, %v1982_v8  ;;  %v2637_v57 = vpop.f32.mrb[10].mxu0 }
 0x413   : > { %v1994_v3 = vadd.f32 %v2637_v57, %v2463_v41  ;;  %v1985_v56 = vpop.f32.mrb[11].mxu0  ;;  %v2015_v60 = vmax.f32 %v1991_v40, 0.0 }
 0x414   : > { %v1986_v39 = vadd.f32 %v2463_v41, %v1985_v56  ;;  %v2013_v5 = vmax.f32 %v1983_v43, 0.0 }
 0x415   : > { %v2016_v36 = vmax.f32 %v1994_v3, 0.0 }
 0x416   : > { %v2014_v20 = vmax.f32 %v1986_v39, 0.0 }
 0x417   : > { %v2022_v50 = vpack.c.bf16 %v2016_v36, %v2015_v60 }
 0x418   : > { %v2021_v11 = vpack.c.bf16 %v2014_v20, %v2013_v5  ;;  %v2640_v34 = vpop.f32.mrb[12].mxu0 }
 0x419   : > { %v2007_v13 = vadd.f32 %v2640_v34, %v2463_v41  ;;  %v1998_v14 = vpop.f32.mrb[13].mxu0 }
 0x41a   : > { %v1999_v63 = vadd.f32 %v2463_v41, %v1998_v14  ;;  %v2641_v37 = vpop.f32.mrb[14].mxu0  ;;  %2658 = vmatprep.mubr.bf16.mxu1 %v2021_v11 }
 0x41b   : > { %v2010_v19 = vadd.f32 %v2641_v37, %v2463_v41  ;;  %v2001_v53 = vpop.f32.mrb[15].mxu0  ;;  %2659 = vmatmul.mubr.bf16.vlgmr.msra.gmra.mrb[8].mxu1 %v2022_v50  ;;  %v2019_v58 = vmax.f32 %v2007_v13, 0.0 }
 0x41c   : > { %v2002_v46 = vadd.f32 %v2463_v41, %v2001_v53  ;;  %v2017_v28 = vmax.f32 %v1999_v63, 0.0 }
 0x41d   : > { %v2020_v59 = vmax.f32 %v2010_v19, 0.0 }
 0x41e   : > { %v2018_v44 = vmax.f32 %v2002_v46, 0.0 }
 0x41f   : > { %v2024_v61 = vpack.c.bf16 %v2020_v59, %v2019_v58 }
 0x420   : > { %v2023_v54 = vpack.c.bf16 %v2018_v44, %v2017_v28 }
 0x422   : > { %2662 = vmatprep.mubr.bf16.mxu1 %v2023_v54 }
 0x423   : > { %2663 = vmatmul.mubr.bf16.gmra.mrb[12].mxu1 %v2024_v61 }
 0x4ee   : > { %v2660_v49 = vpop.f32.mrb[8].mxu1 }
 0x4ef   : > { %v2139_v1 = vadd.f32 %v2660_v49, %v2472_v52  ;;  %v2130_v6 = vpop.f32.mrb[9].mxu1 }
 0x4f0   : > { %v2131_v10 = vadd.f32 %v2472_v52, %v2130_v6  ;;  %v2661_v26 = vpop.f32.mrb[10].mxu1 }
 0x4f1   : > { %v2142_v16 = vadd.f32 %v2661_v26, %v2472_v52  ;;  %v2133_v2 = vpop.f32.mrb[11].mxu1  ;;  %v2163_v42 = vmax.f32 %v2139_v1, 0.0 }
 0x4f2   : > { %v2134_v31 = vadd.f32 %v2472_v52, %v2133_v2  ;;  %v2161_v4 = vmax.f32 %v2131_v10, 0.0 }
 0x4f3   : > { %v2164_v35 = vmax.f32 %v2142_v16, 0.0 }
 0x4f4   : > { %v2162_v55 = vmax.f32 %v2134_v31, 0.0 }
 0x4f5   : > { %v2170_v32 = vpack.c.bf16 %v2164_v35, %v2163_v42 }
 0x4f6   : > { %v2169_v45 = vpack.c.bf16 %v2162_v55, %v2161_v4  ;;  %v2664_v27 = vpop.f32.mrb[12].mxu1 }
 0x4f7   : > { %v2155_v30 = vadd.f32 %v2664_v27, %v2472_v52  ;;  %v2146_v15 = vpop.f32.mrb[13].mxu1 }
 0x4f8   : > { %v2147_v29 = vadd.f32 %v2472_v52, %v2146_v15  ;;  %v2665_v0 = vpop.f32.mrb[14].mxu1  ;;  %2682 = vmatprep.mubr.bf16.mxu0 %v2169_v45 }
 0x4f9   : > { %v2158_v21 = vadd.f32 %v2665_v0, %v2472_v52  ;;  %v2149_v18 = vpop.f32.mrb[15].mxu1  ;;  %2683 = vmatmul.mubr.bf16.vlgmr.msra.gmra.mrb[16].mxu0 %v2170_v32  ;;  %v2167_v33 = vmax.f32 %v2155_v30, 0.0 }
 0x4fa   : > { %v2150_v7 = vadd.f32 %v2472_v52, %v2149_v18  ;;  %v2165_v47 = vmax.f32 %v2147_v29, 0.0 }
 0x4fb   : > { %v2168_v9 = vmax.f32 %v2158_v21, 0.0 }
 0x4fc   : > { %v2166_v23 = vmax.f32 %v2150_v7, 0.0 }
 0x4fd   : > { %v2172_v25 = vpack.c.bf16 %v2168_v9, %v2167_v33 }
 0x4fe   : > { %v2171_v51 = vpack.c.bf16 %v2166_v23, %v2165_v47 }
 0x500   : > { %2686 = vmatprep.mubr.bf16.mxu0 %v2171_v51 }
 0x501   : > { %2687 = vmatmul.mubr.bf16.gmra.mrb[20].mxu0 %v2172_v25 }
 0x5cc   : > { %v2684_v24 = vpop.f32.mrb[16].mxu0 }
 0x5cd   : > { %v2287_v62 = vadd.f32 %v2684_v24, %v2481_v38  ;;  %v2278_v22 = vpop.f32.mrb[17].mxu0 }
 0x5ce   : > { %v2279_v41 = vadd.f32 %v2481_v38, %v2278_v22  ;;  %v2685_v17 = vpop.f32.mrb[18].mxu0 }
 0x5cf   : > { %2312 = vst.msk [vmem:[%s518_s24 + $0x10] sm:$0xff] %vm2309_vm14, %v2287_v62  ;;  %v2290_v40 = vadd.f32 %v2685_v17, %v2481_v38  ;;  %v2281_v8 = vpop.f32.mrb[19].mxu0 }
 0x5d0   : > { %2310 = vst.msk [vmem:[%s518_s24] sm:$0xff] %vm2309_vm14, %v2279_v41  ;;  %v2282_v43 = vadd.f32 %v2481_v38, %v2281_v8 }
 0x5d1   : > { %2313 = vst.msk [vmem:[%s518_s24 + $0x18] sm:$0xff] %vm2309_vm14, %v2290_v40 }
 0x5d2   : > { %2311 = vst.msk [vmem:[%s518_s24 + $0x8] sm:$0xff] %vm2309_vm14, %v2282_v43 }
 0x5d4   : > { %v2688_v57 = vpop.f32.mrb[20].mxu0 }
 0x5d5   : > { %v2303_v3 = vadd.f32 %v2688_v57, %v2481_v38  ;;  %v2294_v56 = vpop.f32.mrb[21].mxu0 }
 0x5d6   : > { %v2295_v39 = vadd.f32 %v2481_v38, %v2294_v56  ;;  %v2689_v60 = vpop.f32.mrb[22].mxu0 }
 0x5d7   : > { %2316 = vst.msk [vmem:[%s518_s24 + $0x30] sm:$0xff] %vm2309_vm14, %v2303_v3  ;;  %v2306_v36 = vadd.f32 %v2689_v60, %v2481_v38  ;;  %v2297_v5 = vpop.f32.mrb[23].mxu0 }
 0x5d8   : > { %2314 = vst.msk [vmem:[%s518_s24 + $0x20] sm:$0xff] %vm2309_vm14, %v2295_v39  ;;  %v2298_v20 = vadd.f32 %v2481_v38, %v2297_v5 }
 0x5d9   : > { %2317 = vst.msk [vmem:[%s518_s24 + $0x38] sm:$0xff] %vm2309_vm14, %v2306_v36 }
 0x5da   : > { %2315 = vst.msk [vmem:[%s518_s24 + $0x28] sm:$0xff] %vm2309_vm14, %v2298_v20 }
 0x5db PF: > { %s25_s18 = sadd.s32 1, %s2860_s18  }
 0x5dc   : > { %p22_p4 = scmp.ge.s32.totalorder %s25_s18, 6  }
 0x5de   :  { %24 = sbr.rel (!%p22_p4) target bundleno = 1 (0x1), region = 113 }

</bundles_post_ra>
